<compile_context>
chip_gen: v7x
topology: tpu7x:2x2x1
jax: 0.10.0
libtpu: 0.0.40
codegen_flags: <defaults>
</compile_context>

<pallas_src>
import math

import jax
import jax.numpy as jnp
from jax import lax
from jax.experimental import pallas as pl
from jax.experimental.pallas import tpu as pltpu


# --------------------------------------------------------------------------
# betabinom pmf (no scipy dependency) -- matches scipy.stats.betabinom.pmf
# --------------------------------------------------------------------------
def betabinom_pmf(k, n, a, b):
    return math.exp(
        math.lgamma(n + 1) - math.lgamma(k + 1) - math.lgamma(n - k + 1)
        + math.lgamma(k + a) + math.lgamma(n - k + b) - math.lgamma(n + a + b)
        - (math.lgamma(a) + math.lgamma(b) - math.lgamma(a + b))
    )


# --------------------------------------------------------------------------
# Pallas kernel: S fused DCA decoder steps, fully batched across B.
# Layout: encoder time axis right-padded per batch to Tp and the whole batch
# flattened onto the LANE axis as one [1, B*Tp] row (B*Tp multiple of 128).
# --------------------------------------------------------------------------
def dca_fused_kernel(q_ref, aw0_ref, valid_ref, maskf_ref, inp_ref,
                     wq_ref, bq_ref, wk_ref, wstat_ref, wdl_ref, bd_ref, v_ref,
                     prior_ref,
                     attn_out_ref, ctx_out_ref,
                     aw_state):
    f32 = jnp.float32
    BTp = aw0_ref.shape[1]
    B = q_ref.shape[2]
    Tp = BTp // B
    _, sks = wstat_ref.shape
    dfd = wdl_ref.shape[1]
    dks = wk_ref.shape[0] // dfd
    P = prior_ref.shape[1]
    pad_s = (sks - 1) // 2
    pad_d = (dks - 1) // 2

    step = pl.program_id(0)

    # ---- recurrent carry: (re)initialise the attention-weight state at step 0
    @pl.when(step == 0)
    def _():
        aw_state[...] = aw0_ref[...]

    aw = aw_state[...]                                          # [1, B*Tp] f32

    # ---- shifted rows: one XLU roll per distinct conv offset, whole batch at
    # once.  Per-batch zero padding (>= max offset) absorbs both the conv
    # zero-padding and the roll wrap-around, so no masking is needed.
    offsets = sorted({k - pad_s for k in range(sks)}
                     | {k - pad_d for k in range(dks)}
                     | {j - (P - 1) for j in range(P)})
    rolled = {off: (aw if off == 0 else pltpu.roll(aw, (-off) % BTp, axis=1))
              for off in offsets}

    # ---- prior conv (causal, flipped pmf): P broadcast FMAs, then log clamp
    pr = prior_ref[...]                                         # [1, P]
    prior_out = pr[:, 0:1] * rolled[0 - (P - 1)]
    for j in range(1, P):
        prior_out = prior_out + pr[:, j:j + 1] * rolled[j - (P - 1)]
    prior_log = jnp.log(jnp.maximum(prior_out, f32(1e-6)))      # [1, B*Tp]

    # ---- static conv + static linear layer (folded host-side to [A, sks]):
    # sks broadcast FMAs instead of sublane concatenate + tiny matmul
    wstat = wstat_ref[...]                                      # [A, sks]
    stat_e = wstat[:, 0:1] * rolled[0 - pad_s]
    for k in range(1, sks):
        stat_e = stat_e + wstat[:, k:k + 1] * rolled[k - pad_s]  # [A, B*Tp]

    # ---- dynamic filters G = key_layer(tanh(query_layer(q))), transposed
    h = jnp.tanh(jnp.dot(wq_ref[...], q_ref[0],
                         preferred_element_type=f32) + bq_ref[...])   # [A, B]
    g = jnp.dot(wk_ref[...], h, preferred_element_type=f32)     # [dks*dfd, B]

    # ---- per-batch segment indicator rebuilt in-kernel (no HBM operand)
    col = lax.broadcasted_iota(jnp.int32, (B, BTp), 1)
    lo = lax.broadcasted_iota(jnp.int32, (B, BTp), 0) * Tp
    segb = (col >= lo) & (col < lo + Tp)                        # [B, B*Tp] bool
    seg = segb.astype(f32)

    # expand per-batch dynamic filters onto the flattened lane axis
    gexp = jnp.dot(g, seg, preferred_element_type=f32)          # [dks*dfd, B*Tp]

    # ---- dynamic conv: dks full-batch FMAs
    dyn = gexp[0:dfd, :] * rolled[0 - pad_d]
    for k in range(1, dks):
        dyn = dyn + gexp[k * dfd:(k + 1) * dfd, :] * rolled[k - pad_d]

    # ---- energy / alignment (v-reduction on the MXU)
    energy = jnp.tanh(stat_e
                      + jnp.dot(wdl_ref[...], dyn, preferred_element_type=f32)
                      + bd_ref[...])                            # [A, B*Tp]
    align = jnp.dot(v_ref[...], energy,
                    preferred_element_type=f32) + prior_log     # [1, B*Tp]

    # ---- softmax over each per-batch segment (per-batch max shift)
    neg = f32(-1e30)
    align = jnp.where(valid_ref[...] > 0, align, neg)
    m_b = jnp.max(jnp.where(segb, align, neg), axis=1, keepdims=True)   # [B, 1]
    m_bc = jnp.sum(seg * m_b, axis=0, keepdims=True)                    # [1, B*Tp]
    e = jnp.exp(align - m_bc)                       # exactly 0 at padded lanes
    d_b = jnp.sum(seg * e, axis=1, keepdims=True)                       # [B, 1]
    d_b = jnp.where(d_b > 0, d_b, f32(1.0))         # fully-masked-row guard
    r_b = pl.reciprocal(d_b, approx=True)
    r_b = r_b * (f32(2.0) - d_b * r_b)              # one Newton step (exact-ish)
    r_bc = jnp.sum(seg * r_b, axis=0, keepdims=True)                    # [1, B*Tp]
    attn = e * r_bc
    # post-softmax masked fill (matches the PyTorch module, including the
    # state that feeds back into the next step's convolutions)
    attn = jnp.where(maskf_ref[...] > 0, attn, f32(1e-8))

    aw_state[...] = attn
    attn_out_ref[0] = attn.astype(attn_out_ref.dtype)

    # ---- context: bf16 x bf16 matmul, f32 accumulate; segment indicator
    # keeps batches separate
    attn_seg = (seg * attn).astype(inp_ref.dtype)               # [B, B*Tp]
    ctx_out_ref[0] = jnp.dot(attn_seg, inp_ref[...],
                             preferred_element_type=f32).astype(ctx_out_ref.dtype)


# --------------------------------------------------------------------------
# One-time parameter preparation (hoisted out of the per-call path)
# --------------------------------------------------------------------------
def prepare_dca(params):
    f32 = jnp.float32
    Wq = params["Wq"].astype(f32)                   # [A, Qd]
    bq = params["bq"].astype(f32)[:, None]          # [A, 1]
    Wk = params["Wk"].astype(f32)                   # [dfd*dks, A]
    Wsc = params["Wsc"].astype(f32)                 # [sfd, 1, sks]
    Wsl = params["Wsl"].astype(f32)                 # [A, sfd]
    Wdl = params["Wdl"].astype(f32)                 # [A, dfd]
    bd = params["bd"].astype(f32)[:, None]          # [A, 1]
    v = params["v"].astype(f32)                     # [1, A]
    prior = params["prior"].astype(f32)[None, :]    # [1, P]

    A = Wq.shape[0]
    dfd = Wdl.shape[1]
    dks = Wk.shape[0] // dfd
    # key-layer rows reordered (f-major, k) -> (k-major, f): per-tap dynamic
    # filter blocks become contiguous, sublane-aligned slices in the kernel
    wk_t = Wk.reshape(dfd, dks, A).transpose(1, 0, 2).reshape(dks * dfd, A)
    # fold the (bias-free) static linear layer into the static conv weights
    wstat = Wsl @ Wsc[:, 0, :]                      # [A, sks]
    return dict(wq=Wq, bq=bq, wk=wk_t, wstat=wstat, wdl=Wdl, bd=bd, v=v,
                prior=prior)


# --------------------------------------------------------------------------
# Wrapper: S fused decoder steps in one pallas_call
# --------------------------------------------------------------------------
def dca_forward_fused(queries, inputs, attention_weights, mask, prep):
    """queries: [S,B,Qd]; inputs: [B,T,D]; attention_weights: [B,T]; mask: [B,T]
    Returns (context [S,B,D], attention [S,B,T]); attention[-1] is the new
    recurrent state."""
    f32 = jnp.float32
    S, B, Qd = queries.shape
    _, T, D = inputs.shape
    A, sks = prep["wstat"].shape
    dfd = prep["wdl"].shape[1]
    dks = prep["wk"].shape[0] // dfd
    P = prep["prior"].shape[1]
    max_pad = max(P - 1, (sks - 1) // 2, (dks - 1) // 2)

    # pad T so that (a) per-batch zero padding absorbs every conv shift / roll
    # wrap and (b) B*Tp is a multiple of 128 (lane-dense rows).
    lane_step = 128 // math.gcd(B, 128)
    Tp = ((T + max_pad + lane_step - 1) // lane_step) * lane_step
    BTp = B * Tp
    assert Tp - T >= max_pad

    q_all = jnp.transpose(queries.astype(f32), (0, 2, 1))        # [S, Qd, B]
    aw0 = jnp.pad(attention_weights.astype(f32),
                  ((0, 0), (0, Tp - T))).reshape(1, BTp)
    valid = jnp.tile((jnp.arange(Tp) < T).astype(f32), (B,)).reshape(1, BTp)
    maskf = jnp.pad(mask.astype(f32), ((0, 0), (0, Tp - T)),
                    constant_values=1.0).reshape(1, BTp)
    # encoder memory: flattened, true feature width (no lane padding), bf16
    inp = jnp.pad(inputs.astype(jnp.bfloat16),
                  ((0, 0), (0, Tp - T), (0, 0))).reshape(BTp, D)

    def fixed(shape):   # constant-index block -> DMA'd once, resident all steps
        return pl.BlockSpec(shape, lambda s, _n=len(shape): (0,) * _n)

    attn_all, ctx_all = pl.pallas_call(
        dca_fused_kernel,
        out_shape=(jax.ShapeDtypeStruct((S, 1, BTp), f32),
                   jax.ShapeDtypeStruct((S, B, D), f32)),
        grid=(S,),
        in_specs=[
            pl.BlockSpec((1, Qd, B), lambda s: (s, 0, 0)),       # per-step query
            fixed((1, BTp)),                                     # aw0
            fixed((1, BTp)),                                     # valid lanes
            fixed((1, BTp)),                                     # mask fill
            fixed((BTp, D)),                                     # encoder memory
            fixed((A, Qd)), fixed((A, 1)),                       # Wq, bq
            fixed((dks * dfd, A)),                               # Wk (k-major)
            fixed((A, sks)),                                     # Wsl @ Wsc
            fixed((A, dfd)), fixed((A, 1)),                      # Wdl, bd
            fixed((1, A)),                                       # v
            fixed((1, P)),                                       # prior pmf
        ],
        out_specs=(pl.BlockSpec((1, 1, BTp), lambda s: (s, 0, 0)),
                   pl.BlockSpec((1, B, D), lambda s: (s, 0, 0))),
        scratch_shapes=[pltpu.VMEM((1, BTp), f32)],
        compiler_params=pltpu.CompilerParams(
            dimension_semantics=("arbitrary",)),
    )(q_all, aw0, valid, maskf, inp,
      prep["wq"], prep["bq"], prep["wk"], prep["wstat"],
      prep["wdl"], prep["bd"], prep["v"], prep["prior"])

    attn = attn_all.reshape(S, B, Tp)[:, :, :T]
    return ctx_all, attn


# --------------------------------------------------------------------------
# Pure-JAX reference (mirrors the PyTorch forward exactly), rolled out over S
# --------------------------------------------------------------------------
def dca_reference(query, inputs, aw, mask, params):
    Wq, bq, Wk, Wsc, Wsl, Wdl, bd, v, prior = (
        params["Wq"], params["bq"], params["Wk"], params["Wsc"],
        params["Wsl"], params["Wdl"], params["bd"], params["v"],
        params["prior"])
    B, T = aw.shape
    dfd = Wdl.shape[1]
    dks = Wk.shape[0] // dfd
    sks = Wsc.shape[2]
    P = prior.shape[0]
    dn = ("NCH", "OIH", "NCH")

    prior_out = lax.conv_general_dilated(
        jnp.pad(aw, ((0, 0), (P - 1, 0)))[:, None, :],
        prior[None, None, :], (1,), "VALID", dimension_numbers=dn)[:, 0, :]
    prior_log = jnp.log(jnp.maximum(prior_out, 1e-6))

    h = jnp.tanh(query @ Wq.T + bq)
    G = h @ Wk.T
    dyn = lax.conv_general_dilated(
        aw[None, :, :], G.reshape(B * dfd, 1, dks), (1,),
        [((dks - 1) // 2, (dks - 1) // 2)], dimension_numbers=dn,
        feature_group_count=B)
    dyn = dyn.reshape(B, dfd, T).transpose(0, 2, 1)
    stat = lax.conv_general_dilated(
        aw[:, None, :], Wsc, (1,),
        [((sks - 1) // 2, (sks - 1) // 2)],
        dimension_numbers=dn).transpose(0, 2, 1)

    energy = jnp.tanh(stat @ Wsl.T + dyn @ Wdl.T + bd)
    align = (energy @ v.T)[..., 0] + prior_log
    attn = jax.nn.softmax(align, axis=-1)
    attn = jnp.where(mask, attn, 1e-8)
    ctx = jnp.einsum("bt,btd->bd", attn, inputs)
    return ctx, attn


def dca_reference_rollout(queries, inputs, aw0, mask, params):
    aw = aw0
    ctxs, attns = [], []
    for s in range(queries.shape[0]):
        ctx, attn = dca_reference(queries[s], inputs, aw, mask, params)
        ctxs.append(ctx)
        attns.append(attn)
        aw = attn           # post-mask weights feed back, as in the module
    return jnp.stack(ctxs), jnp.stack(attns)


# --------------------------------------------------------------------------
if __name__ == "__main__":
    # module hyper-parameters
    B = 2
    query_dim = 16
    embedding_dim = 24
    attention_dim = 32
    static_filter_dim = 8
    static_kernel_size = 5
    dynamic_filter_dim = 8
    dynamic_kernel_size = 7
    prior_filter_len = 11
    alpha, beta = 0.1, 0.9
    T = 16
    S = 4                      # decoder steps fused into one pallas_call

    key = jax.random.PRNGKey(0)
    ks = jax.random.split(key, 10)
    s = 0.2
    params = {
        "Wq":  jax.random.normal(ks[0], (attention_dim, query_dim), jnp.float32) * s,
        "bq":  jax.random.normal(ks[1], (attention_dim,), jnp.float32) * s,
        "Wk":  jax.random.normal(ks[2], (dynamic_filter_dim * dynamic_kernel_size,
                                         attention_dim), jnp.float32) * s,
        "Wsc": jax.random.normal(ks[3], (static_filter_dim, 1, static_kernel_size),
                                 jnp.float32) * s,
        "Wsl": jax.random.normal(ks[4], (attention_dim, static_filter_dim),
                                 jnp.float32) * s,
        "Wdl": jax.random.normal(ks[5], (attention_dim, dynamic_filter_dim),
                                 jnp.float32) * s,
        "bd":  jax.random.normal(ks[6], (attention_dim,), jnp.float32) * s,
        "v":   jax.random.normal(ks[7], (1, attention_dim), jnp.float32) * s,
    }
    pmf = [betabinom_pmf(k, prior_filter_len - 1, alpha, beta)
           for k in range(prior_filter_len)]
    params["prior"] = jnp.asarray(pmf[::-1], dtype=jnp.float32)   # flipped buffer

    # inputs / initial state (as produced by init_states)
    queries = jax.random.normal(ks[8], (S, B, query_dim), jnp.float32)
    inputs = jax.random.normal(ks[9], (B, T, embedding_dim), jnp.float32)
    attention_weights = jnp.zeros((B, T), jnp.float32).at[:, 0].set(1.0)
    mask = jnp.ones((B, T), dtype=bool).at[1, 12:].set(False)

    prep = prepare_dca(params)                 # once per sequence, not per step
    fused = jax.jit(dca_forward_fused)
    ctx_all, attn_all = fused(queries, inputs, attention_weights, mask, prep)
    jax.block_until_ready((ctx_all, attn_all))

    ctx_ref, attn_ref = dca_reference_rollout(queries, inputs,
                                              attention_weights, mask, params)
    # attention stays f32 end-to-end (Newton-refined reciprocal) -> tight check;
    # context tolerance reflects the bf16 x bf16 context matmul.
    assert jnp.allclose(attn_all, attn_ref, atol=2e-3, rtol=2e-3), "attention mismatch"
    assert jnp.allclose(ctx_all, ctx_ref, atol=3e-2, rtol=3e-2), "context mismatch"

    print("KERNEL_OK")
</pallas_src>

<mosaic_0001>
module attributes {stable_mosaic.version = 11 : i64} {
  func.func @dca_fused_kernel(%arg0: i32, %arg1: memref<1x16x2xf32, #tpu.memory_space<vmem>>, %arg2: memref<1x128xf32, #tpu.memory_space<vmem>>, %arg3: memref<1x128xf32, #tpu.memory_space<vmem>>, %arg4: memref<1x128xf32, #tpu.memory_space<vmem>>, %arg5: memref<128x24xbf16, #tpu.memory_space<vmem>>, %arg6: memref<32x16xf32, #tpu.memory_space<vmem>>, %arg7: memref<32x1xf32, #tpu.memory_space<vmem>>, %arg8: memref<56x32xf32, #tpu.memory_space<vmem>>, %arg9: memref<32x5xf32, #tpu.memory_space<vmem>>, %arg10: memref<32x8xf32, #tpu.memory_space<vmem>>, %arg11: memref<32x1xf32, #tpu.memory_space<vmem>>, %arg12: memref<1x32xf32, #tpu.memory_space<vmem>>, %arg13: memref<1x11xf32, #tpu.memory_space<vmem>>, %arg14: memref<1x1x128xf32, #tpu.memory_space<vmem>>, %arg15: memref<1x2x24xf32, #tpu.memory_space<vmem>>, %arg16: memref<1x128xf32, #tpu.memory_space<vmem>>) attributes {dimension_semantics = [#tpu.dimension_semantics<arbitrary>], iteration_bounds = array<i64: 4>, scalar_prefetch = 0 : i64, scratch_operands = 1 : i64, tpu.core_type = #tpu.core_type<tc>, window_params = [{transform_indices = @transform_0, window_bounds = array<i64: 1, 16, 2>}, {pipeline_mode = #tpu.pipeline_mode<synchronous>, transform_indices = @transform_1, window_bounds = array<i64: 1, 128>}, {pipeline_mode = #tpu.pipeline_mode<synchronous>, transform_indices = @transform_2, window_bounds = array<i64: 1, 128>}, {pipeline_mode = #tpu.pipeline_mode<synchronous>, transform_indices = @transform_3, window_bounds = array<i64: 1, 128>}, {pipeline_mode = #tpu.pipeline_mode<synchronous>, transform_indices = @transform_4, window_bounds = array<i64: 128, 24>}, {pipeline_mode = #tpu.pipeline_mode<synchronous>, transform_indices = @transform_5, window_bounds = array<i64: 32, 16>}, {pipeline_mode = #tpu.pipeline_mode<synchronous>, transform_indices = @transform_6, window_bounds = array<i64: 32, 1>}, {pipeline_mode = #tpu.pipeline_mode<synchronous>, transform_indices = @transform_7, window_bounds = array<i64: 56, 32>}, {pipeline_mode = #tpu.pipeline_mode<synchronous>, transform_indices = @transform_8, window_bounds = array<i64: 32, 5>}, {pipeline_mode = #tpu.pipeline_mode<synchronous>, transform_indices = @transform_9, window_bounds = array<i64: 32, 8>}, {pipeline_mode = #tpu.pipeline_mode<synchronous>, transform_indices = @transform_10, window_bounds = array<i64: 32, 1>}, {pipeline_mode = #tpu.pipeline_mode<synchronous>, transform_indices = @transform_11, window_bounds = array<i64: 1, 32>}, {pipeline_mode = #tpu.pipeline_mode<synchronous>, transform_indices = @transform_12, window_bounds = array<i64: 1, 11>}, {transform_indices = @transform_13, window_bounds = array<i64: 1, 1, 128>}, {transform_indices = @transform_14, window_bounds = array<i64: 1, 2, 24>}]} {
    %c0_i32 = arith.constant 0 : i32
    %0 = arith.cmpi eq, %arg0, %c0_i32 : i32
    %1 = arith.extui %0 : i1 to i32
    %c0_i32_0 = arith.constant 0 : i32
    %2 = arith.cmpi ne, %1, %c0_i32_0 : i32
    scf.if %2 {
      %c0_54 = arith.constant 0 : index
      %c0_55 = arith.constant 0 : index
      %200 = vector.load %arg2[%c0_54, %c0_55] : memref<1x128xf32, #tpu.memory_space<vmem>>, vector<1x128xf32>
      %c0_56 = arith.constant 0 : index
      %c0_57 = arith.constant 0 : index
      %201 = vector.load %arg16[%c0_56, %c0_57] : memref<1x128xf32, #tpu.memory_space<vmem>>, vector<1x128xf32>
      tpu.vector_store %arg16[%c0_56, %c0_57], %200 {strides = array<i32>} : memref<1x128xf32, #tpu.memory_space<vmem>>, vector<1x128xf32>,
    } else {
    }
    %c0 = arith.constant 0 : index
    %c0_1 = arith.constant 0 : index
    %3 = vector.load %arg16[%c0, %c0_1] : memref<1x128xf32, #tpu.memory_space<vmem>>, vector<1x128xf32>
    %c10_i32 = arith.constant 10 : i32
    %4 = tpu.dynamic_rotate %3 by %c10_i32 dim 1 : vector<1x128xf32>, i32 -> vector<1x128xf32>
    %c9_i32 = arith.constant 9 : i32
    %5 = tpu.dynamic_rotate %3 by %c9_i32 dim 1 : vector<1x128xf32>, i32 -> vector<1x128xf32>
    %c8_i32 = arith.constant 8 : i32
    %6 = tpu.dynamic_rotate %3 by %c8_i32 dim 1 : vector<1x128xf32>, i32 -> vector<1x128xf32>
    %c7_i32 = arith.constant 7 : i32
    %7 = tpu.dynamic_rotate %3 by %c7_i32 dim 1 : vector<1x128xf32>, i32 -> vector<1x128xf32>
    %c6_i32 = arith.constant 6 : i32
    %8 = tpu.dynamic_rotate %3 by %c6_i32 dim 1 : vector<1x128xf32>, i32 -> vector<1x128xf32>
    %c5_i32 = arith.constant 5 : i32
    %9 = tpu.dynamic_rotate %3 by %c5_i32 dim 1 : vector<1x128xf32>, i32 -> vector<1x128xf32>
    %c4_i32 = arith.constant 4 : i32
    %10 = tpu.dynamic_rotate %3 by %c4_i32 dim 1 : vector<1x128xf32>, i32 -> vector<1x128xf32>
    %c3_i32 = arith.constant 3 : i32
    %11 = tpu.dynamic_rotate %3 by %c3_i32 dim 1 : vector<1x128xf32>, i32 -> vector<1x128xf32>
    %c2_i32 = arith.constant 2 : i32
    %12 = tpu.dynamic_rotate %3 by %c2_i32 dim 1 : vector<1x128xf32>, i32 -> vector<1x128xf32>
    %c1_i32 = arith.constant 1 : i32
    %13 = tpu.dynamic_rotate %3 by %c1_i32 dim 1 : vector<1x128xf32>, i32 -> vector<1x128xf32>
    %c127_i32 = arith.constant 127 : i32
    %14 = tpu.dynamic_rotate %3 by %c127_i32 dim 1 : vector<1x128xf32>, i32 -> vector<1x128xf32>
    %c126_i32 = arith.constant 126 : i32
    %15 = tpu.dynamic_rotate %3 by %c126_i32 dim 1 : vector<1x128xf32>, i32 -> vector<1x128xf32>
    %c125_i32 = arith.constant 125 : i32
    %16 = tpu.dynamic_rotate %3 by %c125_i32 dim 1 : vector<1x128xf32>, i32 -> vector<1x128xf32>
    %c0_2 = arith.constant 0 : index
    %c0_3 = arith.constant 0 : index
    %17 = vector.load %arg13[%c0_2, %c0_3] : memref<1x11xf32, #tpu.memory_space<vmem>>, vector<1x11xf32>
    %18 = vector.extract_strided_slice %17 {offsets = [0, 0], sizes = [1, 1], strides = [1, 1]} : vector<1x11xf32> to vector<1x1xf32>
    %19 = vector.broadcast %18 : vector<1x1xf32> to vector<1x128xf32>
    %20 = arith.mulf %19, %4 : vector<1x128xf32>
    %21 = vector.extract_strided_slice %17 {offsets = [0, 1], sizes = [1, 1], strides = [1, 1]} : vector<1x11xf32> to vector<1x1xf32>
    %22 = vector.broadcast %21 : vector<1x1xf32> to vector<1x128xf32>
    %23 = arith.mulf %22, %5 : vector<1x128xf32>
    %24 = arith.addf %20, %23 : vector<1x128xf32>
    %25 = vector.extract_strided_slice %17 {offsets = [0, 2], sizes = [1, 1], strides = [1, 1]} : vector<1x11xf32> to vector<1x1xf32>
    %26 = vector.broadcast %25 : vector<1x1xf32> to vector<1x128xf32>
    %27 = arith.mulf %26, %6 : vector<1x128xf32>
    %28 = arith.addf %24, %27 : vector<1x128xf32>
    %29 = vector.extract_strided_slice %17 {offsets = [0, 3], sizes = [1, 1], strides = [1, 1]} : vector<1x11xf32> to vector<1x1xf32>
    %30 = vector.broadcast %29 : vector<1x1xf32> to vector<1x128xf32>
    %31 = arith.mulf %30, %7 : vector<1x128xf32>
    %32 = arith.addf %28, %31 : vector<1x128xf32>
    %33 = vector.extract_strided_slice %17 {offsets = [0, 4], sizes = [1, 1], strides = [1, 1]} : vector<1x11xf32> to vector<1x1xf32>
    %34 = vector.broadcast %33 : vector<1x1xf32> to vector<1x128xf32>
    %35 = arith.mulf %34, %8 : vector<1x128xf32>
    %36 = arith.addf %32, %35 : vector<1x128xf32>
    %37 = vector.extract_strided_slice %17 {offsets = [0, 5], sizes = [1, 1], strides = [1, 1]} : vector<1x11xf32> to vector<1x1xf32>
    %38 = vector.broadcast %37 : vector<1x1xf32> to vector<1x128xf32>
    %39 = arith.mulf %38, %9 : vector<1x128xf32>
    %40 = arith.addf %36, %39 : vector<1x128xf32>
    %41 = vector.extract_strided_slice %17 {offsets = [0, 6], sizes = [1, 1], strides = [1, 1]} : vector<1x11xf32> to vector<1x1xf32>
    %42 = vector.broadcast %41 : vector<1x1xf32> to vector<1x128xf32>
    %43 = arith.mulf %42, %10 : vector<1x128xf32>
    %44 = arith.addf %40, %43 : vector<1x128xf32>
    %45 = vector.extract_strided_slice %17 {offsets = [0, 7], sizes = [1, 1], strides = [1, 1]} : vector<1x11xf32> to vector<1x1xf32>
    %46 = vector.broadcast %45 : vector<1x1xf32> to vector<1x128xf32>
    %47 = arith.mulf %46, %11 : vector<1x128xf32>
    %48 = arith.addf %44, %47 : vector<1x128xf32>
    %49 = vector.extract_strided_slice %17 {offsets = [0, 8], sizes = [1, 1], strides = [1, 1]} : vector<1x11xf32> to vector<1x1xf32>
    %50 = vector.broadcast %49 : vector<1x1xf32> to vector<1x128xf32>
    %51 = arith.mulf %50, %12 : vector<1x128xf32>
    %52 = arith.addf %48, %51 : vector<1x128xf32>
    %53 = vector.extract_strided_slice %17 {offsets = [0, 9], sizes = [1, 1], strides = [1, 1]} : vector<1x11xf32> to vector<1x1xf32>
    %54 = vector.broadcast %53 : vector<1x1xf32> to vector<1x128xf32>
    %55 = arith.mulf %54, %13 : vector<1x128xf32>
    %56 = arith.addf %52, %55 : vector<1x128xf32>
    %57 = vector.extract_strided_slice %17 {offsets = [0, 10], sizes = [1, 1], strides = [1, 1]} : vector<1x11xf32> to vector<1x1xf32>
    %58 = vector.broadcast %57 : vector<1x1xf32> to vector<1x128xf32>
    %59 = arith.mulf %58, %3 : vector<1x128xf32>
    %60 = arith.addf %56, %59 : vector<1x128xf32>
    %cst = arith.constant 9.99999997E-7 : f32
    %61 = vector.broadcast %cst : f32 to vector<1x128xf32>
    %62 = arith.maximumf %60, %61 : vector<1x128xf32>
    %63 = math.log %62 : vector<1x128xf32>
    %c0_4 = arith.constant 0 : index
    %c0_5 = arith.constant 0 : index
    %64 = vector.load %arg9[%c0_4, %c0_5] : memref<32x5xf32, #tpu.memory_space<vmem>>, vector<32x5xf32>
    %65 = vector.extract_strided_slice %64 {offsets = [0, 0], sizes = [32, 1], strides = [1, 1]} : vector<32x5xf32> to vector<32x1xf32>
    %66 = vector.broadcast %65 : vector<32x1xf32> to vector<32x128xf32>
    %67 = vector.broadcast %12 : vector<1x128xf32> to vector<32x128xf32>
    %68 = arith.mulf %66, %67 : vector<32x128xf32>
    %69 = vector.extract_strided_slice %64 {offsets = [0, 1], sizes = [32, 1], strides = [1, 1]} : vector<32x5xf32> to vector<32x1xf32>
    %70 = vector.broadcast %69 : vector<32x1xf32> to vector<32x128xf32>
    %71 = vector.broadcast %13 : vector<1x128xf32> to vector<32x128xf32>
    %72 = arith.mulf %70, %71 : vector<32x128xf32>
    %73 = arith.addf %68, %72 : vector<32x128xf32>
    %74 = vector.extract_strided_slice %64 {offsets = [0, 2], sizes = [32, 1], strides = [1, 1]} : vector<32x5xf32> to vector<32x1xf32>
    %75 = vector.broadcast %74 : vector<32x1xf32> to vector<32x128xf32>
    %76 = vector.broadcast %3 : vector<1x128xf32> to vector<32x128xf32>
    %77 = arith.mulf %75, %76 : vector<32x128xf32>
    %78 = arith.addf %73, %77 : vector<32x128xf32>
    %79 = vector.extract_strided_slice %64 {offsets = [0, 3], sizes = [32, 1], strides = [1, 1]} : vector<32x5xf32> to vector<32x1xf32>
    %80 = vector.broadcast %79 : vector<32x1xf32> to vector<32x128xf32>
    %81 = vector.broadcast %14 : vector<1x128xf32> to vector<32x128xf32>
    %82 = arith.mulf %80, %81 : vector<32x128xf32>
    %83 = arith.addf %78, %82 : vector<32x128xf32>
    %84 = vector.extract_strided_slice %64 {offsets = [0, 4], sizes = [32, 1], strides = [1, 1]} : vector<32x5xf32> to vector<32x1xf32>
    %85 = vector.broadcast %84 : vector<32x1xf32> to vector<32x128xf32>
    %86 = vector.broadcast %15 : vector<1x128xf32> to vector<32x128xf32>
    %87 = arith.mulf %85, %86 : vector<32x128xf32>
    %88 = arith.addf %83, %87 : vector<32x128xf32>
    %c0_6 = arith.constant 0 : index
    %c0_7 = arith.constant 0 : index
    %89 = vector.load %arg6[%c0_6, %c0_7] : memref<32x16xf32, #tpu.memory_space<vmem>>, vector<32x16xf32>
    %c0_8 = arith.constant 0 : index
    %c0_9 = arith.constant 0 : index
    %c0_10 = arith.constant 0 : index
    %90 = vector.load %arg1[%c0_8, %c0_9, %c0_10] : memref<1x16x2xf32, #tpu.memory_space<vmem>>, vector<1x16x2xf32>
    %91 = vector.shape_cast %90 : vector<1x16x2xf32> to vector<16x2xf32>
    %cst_11 = arith.constant dense<0.000000e+00> : vector<32x2xf32>
    %92 = tpu.matmul %89, %91, %cst_11 {dimension_numbers = #tpu.dot_dimension_numbers<[1], [0], [0], [1], [0, 0, 1, 1], [], []>} : vector<32x16xf32>, vector<16x2xf32>, vector<32x2xf32> -> vector<32x2xf32>
    %c0_12 = arith.constant 0 : index
    %c0_13 = arith.constant 0 : index
    %93 = vector.load %arg7[%c0_12, %c0_13] : memref<32x1xf32, #tpu.memory_space<vmem>>, vector<32x1xf32>
    %94 = vector.broadcast %93 : vector<32x1xf32> to vector<32x2xf32>
    %95 = arith.addf %92, %94 : vector<32x2xf32>
    %96 = math.tanh %95 : vector<32x2xf32>
    %c0_14 = arith.constant 0 : index
    %c0_15 = arith.constant 0 : index
    %97 = vector.load %arg8[%c0_14, %c0_15] : memref<56x32xf32, #tpu.memory_space<vmem>>, vector<56x32xf32>
    %cst_16 = arith.constant dense<0.000000e+00> : vector<56x2xf32>
    %98 = tpu.matmul %97, %96, %cst_16 {dimension_numbers = #tpu.dot_dimension_numbers<[1], [0], [0], [1], [0, 0, 1, 1], [], []>} : vector<56x32xf32>, vector<32x2xf32>, vector<56x2xf32> -> vector<56x2xf32>
    %99 = tpu.iota {dimensions = array<i32: 1>} : vector<2x128xi32>
    %100 = tpu.iota {dimensions = array<i32: 0>} : vector<2x128xi32>
    %c64_i32 = arith.constant 64 : i32
    %101 = vector.broadcast %c64_i32 : i32 to vector<2x128xi32>
    %102 = arith.muli %100, %101 : vector<2x128xi32>
    %103 = arith.cmpi sge, %99, %102 : vector<2x128xi32>
    %c64_i32_17 = arith.constant 64 : i32
    %104 = vector.broadcast %c64_i32_17 : i32 to vector<2x128xi32>
    %105 = arith.addi %102, %104 : vector<2x128xi32>
    %106 = arith.cmpi slt, %99, %105 : vector<2x128xi32>
    %107 = arith.andi %103, %106 : vector<2x128xi1>
    %108 = arith.extui %107 : vector<2x128xi1> to vector<2x128xi32>
    %109 = arith.sitofp %108 : vector<2x128xi32> to vector<2x128xf32>
    %cst_18 = arith.constant dense<0.000000e+00> : vector<56x128xf32>
    %110 = tpu.matmul %98, %109, %cst_18 {dimension_numbers = #tpu.dot_dimension_numbers<[1], [0], [0], [1], [0, 0, 1, 1], [], []>} : vector<56x2xf32>, vector<2x128xf32>, vector<56x128xf32> -> vector<56x128xf32>
    %111 = vector.extract_strided_slice %110 {offsets = [0, 0], sizes = [8, 128], strides = [1, 1]} : vector<56x128xf32> to vector<8x128xf32>
    %112 = vector.broadcast %11 : vector<1x128xf32> to vector<8x128xf32>
    %113 = arith.mulf %111, %112 : vector<8x128xf32>
    %114 = vector.extract_strided_slice %110 {offsets = [8, 0], sizes = [8, 128], strides = [1, 1]} : vector<56x128xf32> to vector<8x128xf32>
    %115 = vector.broadcast %12 : vector<1x128xf32> to vector<8x128xf32>
    %116 = arith.mulf %114, %115 : vector<8x128xf32>
    %117 = arith.addf %113, %116 : vector<8x128xf32>
    %118 = vector.extract_strided_slice %110 {offsets = [16, 0], sizes = [8, 128], strides = [1, 1]} : vector<56x128xf32> to vector<8x128xf32>
    %119 = vector.broadcast %13 : vector<1x128xf32> to vector<8x128xf32>
    %120 = arith.mulf %118, %119 : vector<8x128xf32>
    %121 = arith.addf %117, %120 : vector<8x128xf32>
    %122 = vector.extract_strided_slice %110 {offsets = [24, 0], sizes = [8, 128], strides = [1, 1]} : vector<56x128xf32> to vector<8x128xf32>
    %123 = vector.broadcast %3 : vector<1x128xf32> to vector<8x128xf32>
    %124 = arith.mulf %122, %123 : vector<8x128xf32>
    %125 = arith.addf %121, %124 : vector<8x128xf32>
    %126 = vector.extract_strided_slice %110 {offsets = [32, 0], sizes = [8, 128], strides = [1, 1]} : vector<56x128xf32> to vector<8x128xf32>
    %127 = vector.broadcast %14 : vector<1x128xf32> to vector<8x128xf32>
    %128 = arith.mulf %126, %127 : vector<8x128xf32>
    %129 = arith.addf %125, %128 : vector<8x128xf32>
    %130 = vector.extract_strided_slice %110 {offsets = [40, 0], sizes = [8, 128], strides = [1, 1]} : vector<56x128xf32> to vector<8x128xf32>
    %131 = vector.broadcast %15 : vector<1x128xf32> to vector<8x128xf32>
    %132 = arith.mulf %130, %131 : vector<8x128xf32>
    %133 = arith.addf %129, %132 : vector<8x128xf32>
    %134 = vector.extract_strided_slice %110 {offsets = [48, 0], sizes = [8, 128], strides = [1, 1]} : vector<56x128xf32> to vector<8x128xf32>
    %135 = vector.broadcast %16 : vector<1x128xf32> to vector<8x128xf32>
    %136 = arith.mulf %134, %135 : vector<8x128xf32>
    %137 = arith.addf %133, %136 : vector<8x128xf32>
    %c0_19 = arith.constant 0 : index
    %c0_20 = arith.constant 0 : index
    %138 = vector.load %arg10[%c0_19, %c0_20] : memref<32x8xf32, #tpu.memory_space<vmem>>, vector<32x8xf32>
    %cst_21 = arith.constant dense<0.000000e+00> : vector<32x128xf32>
    %139 = tpu.matmul %138, %137, %cst_21 {dimension_numbers = #tpu.dot_dimension_numbers<[1], [0], [0], [1], [0, 0, 1, 1], [], []>} : vector<32x8xf32>, vector<8x128xf32>, vector<32x128xf32> -> vector<32x128xf32>
    %140 = arith.addf %88, %139 : vector<32x128xf32>
    %c0_22 = arith.constant 0 : index
    %c0_23 = arith.constant 0 : index
    %141 = vector.load %arg11[%c0_22, %c0_23] : memref<32x1xf32, #tpu.memory_space<vmem>>, vector<32x1xf32>
    %142 = vector.broadcast %141 : vector<32x1xf32> to vector<32x128xf32>
    %143 = arith.addf %140, %142 : vector<32x128xf32>
    %144 = math.tanh %143 : vector<32x128xf32>
    %c0_24 = arith.constant 0 : index
    %c0_25 = arith.constant 0 : index
    %145 = vector.load %arg12[%c0_24, %c0_25] : memref<1x32xf32, #tpu.memory_space<vmem>>, vector<1x32xf32>
    %cst_26 = arith.constant dense<0.000000e+00> : vector<1x128xf32>
    %146 = tpu.matmul %145, %144, %cst_26 {dimension_numbers = #tpu.dot_dimension_numbers<[1], [0], [0], [1], [0, 0, 1, 1], [], []>} : vector<1x32xf32>, vector<32x128xf32>, vector<1x128xf32> -> vector<1x128xf32>
    %147 = arith.addf %146, %63 : vector<1x128xf32>
    %c0_27 = arith.constant 0 : index
    %c0_28 = arith.constant 0 : index
    %148 = vector.load %arg3[%c0_27, %c0_28] : memref<1x128xf32, #tpu.memory_space<vmem>>, vector<1x128xf32>
    %cst_29 = arith.constant 0.000000e+00 : f32
    %149 = vector.broadcast %cst_29 : f32 to vector<1x128xf32>
    %150 = arith.cmpf ogt, %148, %149 : vector<1x128xf32>
    %cst_30 = arith.constant -1.000000e+30 : f32
    %151 = vector.broadcast %cst_30 : f32 to vector<1x128xf32>
    %152 = arith.select %150, %147, %151 : vector<1x128xi1>, vector<1x128xf32>
    %cst_31 = arith.constant -1.000000e+30 : f32
    %153 = vector.shape_cast %152 : vector<1x128xf32> to vector<1x128xf32>
    %154 = vector.broadcast %153 : vector<1x128xf32> to vector<2x128xf32>
    %155 = vector.broadcast %cst_31 : f32 to vector<2x128xf32>
    %156 = arith.select %107, %154, %155 : vector<2x128xi1>, vector<2x128xf32>
    %cst_32 = arith.constant dense<0xFF800000> : vector<2xf32>
    %157 = vector.multi_reduction <maximumf>, %156, %cst_32 [1] : vector<2x128xf32> to vector<2xf32>
    %158 = vector.shape_cast %157 : vector<2xf32> to vector<2x1xf32>
    %159 = vector.broadcast %158 : vector<2x1xf32> to vector<2x128xf32>
    %160 = arith.mulf %109, %159 : vector<2x128xf32>
    %cst_33 = arith.constant dense<0.000000e+00> : vector<128xf32>
    %161 = vector.multi_reduction <add>, %160, %cst_33 [0] : vector<2x128xf32> to vector<128xf32>
    %162 = vector.shape_cast %161 : vector<128xf32> to vector<1x128xf32>
    %163 = arith.subf %152, %162 : vector<1x128xf32>
    %164 = math.exp %163 : vector<1x128xf32>
    %165 = vector.broadcast %164 : vector<1x128xf32> to vector<2x128xf32>
    %166 = arith.mulf %109, %165 : vector<2x128xf32>
    %cst_34 = arith.constant dense<0.000000e+00> : vector<2xf32>
    %167 = vector.multi_reduction <add>, %166, %cst_34 [1] : vector<2x128xf32> to vector<2xf32>
    %168 = vector.shape_cast %167 : vector<2xf32> to vector<2x1xf32>
    %cst_35 = arith.constant 0.000000e+00 : f32
    %169 = vector.broadcast %cst_35 : f32 to vector<2x1xf32>
    %170 = arith.cmpf ogt, %168, %169 : vector<2x1xf32>
    %cst_36 = arith.constant 1.000000e+00 : f32
    %171 = vector.broadcast %cst_36 : f32 to vector<2x1xf32>
    %172 = arith.select %170, %168, %171 : vector<2x1xi1>, vector<2x1xf32>
    %173 = tpu.reciprocal %172 {approx = true} : vector<2x1xf32> -> vector<2x1xf32>
    %174 = arith.mulf %172, %173 : vector<2x1xf32>
    %cst_37 = arith.constant 2.000000e+00 : f32
    %175 = vector.broadcast %cst_37 : f32 to vector<2x1xf32>
    %176 = arith.subf %175, %174 : vector<2x1xf32>
    %177 = arith.mulf %173, %176 : vector<2x1xf32>
    %178 = vector.broadcast %177 : vector<2x1xf32> to vector<2x128xf32>
    %179 = arith.mulf %109, %178 : vector<2x128xf32>
    %cst_38 = arith.constant dense<0.000000e+00> : vector<128xf32>
    %180 = vector.multi_reduction <add>, %179, %cst_38 [0] : vector<2x128xf32> to vector<128xf32>
    %181 = vector.shape_cast %180 : vector<128xf32> to vector<1x128xf32>
    %182 = arith.mulf %164, %181 : vector<1x128xf32>
    %c0_39 = arith.constant 0 : index
    %c0_40 = arith.constant 0 : index
    %183 = vector.load %arg4[%c0_39, %c0_40] : memref<1x128xf32, #tpu.memory_space<vmem>>, vector<1x128xf32>
    %cst_41 = arith.constant 0.000000e+00 : f32
    %184 = vector.broadcast %cst_41 : f32 to vector<1x128xf32>
    %185 = arith.cmpf ogt, %183, %184 : vector<1x128xf32>
    %cst_42 = arith.constant 9.99999993E-9 : f32
    %186 = vector.broadcast %cst_42 : f32 to vector<1x128xf32>
    %187 = arith.select %185, %182, %186 : vector<1x128xi1>, vector<1x128xf32>
    %c0_43 = arith.constant 0 : index
    %c0_44 = arith.constant 0 : index
    %188 = vector.load %arg16[%c0_43, %c0_44] : memref<1x128xf32, #tpu.memory_space<vmem>>, vector<1x128xf32>
    tpu.vector_store %arg16[%c0_43, %c0_44], %187 {strides = array<i32>} : memref<1x128xf32, #tpu.memory_space<vmem>>, vector<1x128xf32>,
    %c0_45 = arith.constant 0 : index
    %c0_46 = arith.constant 0 : index
    %c0_47 = arith.constant 0 : index
    %189 = vector.load %arg14[%c0_45, %c0_46, %c0_47] : memref<1x1x128xf32, #tpu.memory_space<vmem>>, vector<1x1x128xf32>
    %190 = vector.shape_cast %189 : vector<1x1x128xf32> to vector<1x128xf32>
    %191 = vector.shape_cast %187 : vector<1x128xf32> to vector<1x1x128xf32>
    tpu.vector_store %arg14[%c0_45, %c0_46, %c0_47], %191 {strides = array<i32>} : memref<1x1x128xf32, #tpu.memory_space<vmem>>, vector<1x1x128xf32>,
    %192 = vector.broadcast %187 : vector<1x128xf32> to vector<2x128xf32>
    %193 = arith.mulf %109, %192 : vector<2x128xf32>
    %194 = arith.truncf %193 : vector<2x128xf32> to vector<2x128xbf16>
    %c0_48 = arith.constant 0 : index
    %c0_49 = arith.constant 0 : index
    %195 = vector.load %arg5[%c0_48, %c0_49] : memref<128x24xbf16, #tpu.memory_space<vmem>>, vector<128x24xbf16>
    %cst_50 = arith.constant dense<0.000000e+00> : vector<2x24xf32>
    %196 = tpu.matmul %194, %195, %cst_50 {dimension_numbers = #tpu.dot_dimension_numbers<[1], [0], [0], [1], [0, 0, 1, 1], [], []>} : vector<2x128xbf16>, vector<128x24xbf16>, vector<2x24xf32> -> vector<2x24xf32>
    %c0_51 = arith.constant 0 : index
    %c0_52 = arith.constant 0 : index
    %c0_53 = arith.constant 0 : index
    %197 = vector.load %arg15[%c0_51, %c0_52, %c0_53] : memref<1x2x24xf32, #tpu.memory_space<vmem>>, vector<1x2x24xf32>
    %198 = vector.shape_cast %197 : vector<1x2x24xf32> to vector<2x24xf32>
    %199 = vector.shape_cast %196 : vector<2x24xf32> to vector<1x2x24xf32>
    tpu.vector_store %arg15[%c0_51, %c0_52, %c0_53], %199 {strides = array<i32>} : memref<1x2x24xf32, #tpu.memory_space<vmem>>, vector<1x2x24xf32>,
    return
  }
  func.func @transform_0(%arg0: i32) -> (i32, i32, i32) {
    %c0_i32 = arith.constant 0 : i32
    %c0_i32_0 = arith.constant 0 : i32
    %c0_i32_1 = arith.constant 0 : i32
    return %arg0, %c0_i32, %c0_i32_0 : i32, i32, i32
  }
  func.func @transform_1(%arg0: i32) -> (i32, i32) {
    %c0_i32 = arith.constant 0 : i32
    %c0_i32_0 = arith.constant 0 : i32
    %c0_i32_1 = arith.constant 0 : i32
    return %c0_i32, %c0_i32_0 : i32, i32
  }
  func.func @transform_2(%arg0: i32) -> (i32, i32) {
    %c0_i32 = arith.constant 0 : i32
    %c0_i32_0 = arith.constant 0 : i32
    %c0_i32_1 = arith.constant 0 : i32
    return %c0_i32, %c0_i32_0 : i32, i32
  }
  func.func @transform_3(%arg0: i32) -> (i32, i32) {
    %c0_i32 = arith.constant 0 : i32
    %c0_i32_0 = arith.constant 0 : i32
    %c0_i32_1 = arith.constant 0 : i32
    return %c0_i32, %c0_i32_0 : i32, i32
  }
  func.func @transform_4(%arg0: i32) -> (i32, i32) {
    %c0_i32 = arith.constant 0 : i32
    %c0_i32_0 = arith.constant 0 : i32
    %c0_i32_1 = arith.constant 0 : i32
    return %c0_i32, %c0_i32_0 : i32, i32
  }
  func.func @transform_5(%arg0: i32) -> (i32, i32) {
    %c0_i32 = arith.constant 0 : i32
    %c0_i32_0 = arith.constant 0 : i32
    %c0_i32_1 = arith.constant 0 : i32
    return %c0_i32, %c0_i32_0 : i32, i32
  }
  func.func @transform_6(%arg0: i32) -> (i32, i32) {
    %c0_i32 = arith.constant 0 : i32
    %c0_i32_0 = arith.constant 0 : i32
    %c0_i32_1 = arith.constant 0 : i32
    return %c0_i32, %c0_i32_0 : i32, i32
  }
  func.func @transform_7(%arg0: i32) -> (i32, i32) {
    %c0_i32 = arith.constant 0 : i32
    %c0_i32_0 = arith.constant 0 : i32
    %c0_i32_1 = arith.constant 0 : i32
    return %c0_i32, %c0_i32_0 : i32, i32
  }
  func.func @transform_8(%arg0: i32) -> (i32, i32) {
    %c0_i32 = arith.constant 0 : i32
    %c0_i32_0 = arith.constant 0 : i32
    %c0_i32_1 = arith.constant 0 : i32
    return %c0_i32, %c0_i32_0 : i32, i32
  }
  func.func @transform_9(%arg0: i32) -> (i32, i32) {
    %c0_i32 = arith.constant 0 : i32
    %c0_i32_0 = arith.constant 0 : i32
    %c0_i32_1 = arith.constant 0 : i32
    return %c0_i32, %c0_i32_0 : i32, i32
  }
  func.func @transform_10(%arg0: i32) -> (i32, i32) {
    %c0_i32 = arith.constant 0 : i32
    %c0_i32_0 = arith.constant 0 : i32
    %c0_i32_1 = arith.constant 0 : i32
    return %c0_i32, %c0_i32_0 : i32, i32
  }
  func.func @transform_11(%arg0: i32) -> (i32, i32) {
    %c0_i32 = arith.constant 0 : i32
    %c0_i32_0 = arith.constant 0 : i32
    %c0_i32_1 = arith.constant 0 : i32
    return %c0_i32, %c0_i32_0 : i32, i32
  }
  func.func @transform_12(%arg0: i32) -> (i32, i32) {
    %c0_i32 = arith.constant 0 : i32
    %c0_i32_0 = arith.constant 0 : i32
    %c0_i32_1 = arith.constant 0 : i32
    return %c0_i32, %c0_i32_0 : i32, i32
  }
  func.func @transform_13(%arg0: i32) -> (i32, i32, i32) {
    %c0_i32 = arith.constant 0 : i32
    %c0_i32_0 = arith.constant 0 : i32
    %c0_i32_1 = arith.constant 0 : i32
    return %arg0, %c0_i32, %c0_i32_0 : i32, i32, i32
  }
  func.func @transform_14(%arg0: i32) -> (i32, i32, i32) {
    %c0_i32 = arith.constant 0 : i32
    %c0_i32_0 = arith.constant 0 : i32
    %c0_i32_1 = arith.constant 0 : i32
    return %arg0, %c0_i32, %c0_i32_0 : i32, i32, i32
  }
}

</mosaic_0001>

<bundles_post_ra>
// kernel: tile.8
= control target key start
LH: loop header
LB: loop body
LE: loop exit
PB: predicated region body
PF: predicated region fallthrough
CT: control target
= control target key end

     0   :  { %s22_s0 = inlined_call_operand.vmem [shape: f32[64], index: 0, kind: input, shape index: {}]   ;;  %s23_s1 = inlined_call_operand.vmem [shape: f32[2,64], index: 1, kind: output, shape index: {}]  }
   0x1   :  { %v4_v0 = vld [vmem:[%s22_s0] ss:$0 sm:$0xff] }
   0x2   :  { %5 = vst [vmem:[%s23_s1] sm:$0x3] %v4_v0 }

// kernel: tile.9
= control target key start
LH: loop header
LB: loop body
LE: loop exit
PB: predicated region body
PF: predicated region fallthrough
CT: control target
= control target key end

     0   :  { %vm7_vm0 = vcmask 523264   ;;  %vm13_vm1 = vcmask 1048064   ;;  %s39_s0 = inlined_call_operand.vmem [shape: f32[2,64], index: 0, kind: input, shape index: {}]   ;;  %s40_s1 = inlined_call_operand.vmem [shape: f32[1,128], index: 1, kind: output, shape index: {}]  }
   0x1   :  { %v4_v0 = vld [vmem:[%s39_s0] sm:$0x3]  ;;  %s22_s0 = smov 64  }
   0x2   :  { %5 = vst [vmem:[#allocation1] sm:$0x3] %v4_v0 }
   0x9   :  { %v10_v1 = vld [vmem:[#allocation1 + $0x1] sm:$0x1]   ;;  %v6_v2 = vld [vmem:[#allocation1] sm:$0x1]  }
   0xa   :  { %11 = vrot.lane.b32.xlu0 %v10_v1, %s22_s0  ;;  %8 = vst.msk [vmem:[#allocation0] sm:$0x1] %vm7_vm0, %v6_v2  }
  0x7c   :  { %v12_v3 = vpop.permute.xlu0 %11  }
  0x7d   :  { %14 = vst.msk [vmem:[#allocation0] sm:$0x1] %vm13_vm1, %v12_v3  }
  0x84   :  { %v18_v4 = vld [vmem:[#allocation0] sm:$0x1] }
  0x85   :  { %20 = vst [vmem:[%s40_s1] sm:$0x1] %v18_v4 }

// kernel: dca_forward_fused.1
= control target key start
LH: loop header
LB: loop body
LE: loop exit
PB: predicated region body
PF: predicated region fallthrough
CT: control target
= control target key end

     0   :  { %s2610_s0 = inlined_call_operand.vmem [shape: f32[4,16,2], index: 0, kind: input, shape index: {}]   ;;  %s2611_s1 = inlined_call_operand.vmem [shape: f32[1,128], index: 1, kind: input, shape index: {}]   ;;  %s2612_s2 = inlined_call_operand.vmem [shape: f32[1,128], index: 2, kind: input, shape index: {}]   ;;  %s2613_s3 = inlined_call_operand.vmem [shape: f32[1,128], index: 3, kind: input, shape index: {}]   ;;  %s2614_s4 = inlined_call_operand.vmem [shape: bf16[128,24], index: 4, kind: input, shape index: {}]   ;;  %s2615_s5 = inlined_call_operand.vmem [shape: f32[32,16], index: 5, kind: input, shape index: {}]   ;;  %s2616_s6 = inlined_call_operand.vmem [shape: f32[32,1], index: 6, kind: input, shape index: {}]   ;;  %s2617_s7 = inlined_call_operand.vmem [shape: f32[56,32], index: 7, kind: input, shape index: {}]   ;;  %s2618_s8 = inlined_call_operand.vmem [shape: f32[32,5], index: 8, kind: input, shape index: {}]   ;;  %s2619_s9 = inlined_call_operand.vmem [shape: f32[32,8], index: 9, kind: input, shape index: {}]   ;;  %s2620_s10 = inlined_call_operand.vmem [shape: f32[32,1], index: 10, kind: input, shape index: {}]   ;;  %s2621_s11 = inlined_call_operand.vmem [shape: f32[1,32], index: 11, kind: input, shape index: {}]   ;;  %s2622_s12 = inlined_call_operand.vmem [shape: f32[1,11], index: 12, kind: input, shape index: {}]   ;;  %s2623_s13 = inlined_call_operand.vmem [shape: f32[4,1,128], index: 13, kind: output, shape index: {0}]   ;;  %s2624_s14 = inlined_call_operand.hbm [shape: f32[4,2,24], index: 14, kind: output, shape index: {1}]  }
   0x1   :  { %2633 = sst [smem:[#allocation12_spill]] %s2624_s14 }
   0x2   :  { %20 = vsyncpa [#allocation4], 0 }
   0x3   :  { %22 = vsyncpa [#allocation4 + $0x1], 0  ;;  %s2164_s29 = smov 0   ;;  %s2166_s30 = smov 0  }
   0x4   :  { %s2168_s15 = smov 0   ;;  %s2170_s16 = smov 0  }
   0x5 LB: > { %2634 = sst [smem:[#allocation6_spill]] %s2047_s29  ;;  %s2185_s17 = sadd.s32 4294967295, %s2059_s16   ;;  %s2059_s16 = sphi %s2170_s16, %s2650_s16   ;;  %s2055_s15 = sphi %s2168_s15, %s2652_s15   ;;  %s2051_s30 = sphi %s2166_s30, %s2654_s30   ;;  %s2047_s29 = sphi %s2164_s29, %s2653_s29  }
   0x6   : > { %2635 = sst [smem:[#allocation7_spill]] %s2055_s15  ;;  %s1666_s18 = sadd.s32 4294967294, %s2059_s16  }
   0x7   : > { %2636 = sst [smem:[#allocation8_spill]] %s2059_s16  ;;  %s2189_s19 = sadd.s32 1, %s2059_s16  }
   0x8   : > { %2637 = sst [smem:[#allocation9_spill]] %s2189_s19  ;;  %s339_s20 = sadd.s32 1, %s2055_s15 }
   0x9   : > { %s336_s21 = ssub.s32 %s2059_s16, %s2189_s19  ;;  %p349_p0 = scmp.ne.s32.totalorder %s2055_s15, %s2051_s30 }
   0xa   : > { %p337_p1 = scmp.eq.s32.totalorder %s336_s21, 0  ;;  %p350_p2 = scmp.eq.s32.totalorder %s2185_s17, 3 }
   0xb   : > { %p355_p3 = scmp.ne.s32.totalorder %s2051_s30, %s2047_s29  ;;  %p356_p4 = scmp.eq.s32.totalorder %s1666_s18, 3 }
   0xc   : > { %s2200_s22 = scalar_select %p337_p1, %s2055_s15, %s339_s20  }
   0xd   : > { %p2202_p5 = por %p350_p2, %p349_p0  ;;  %p2206_p6 = por %p356_p4, %p355_p3 }
   0xe   : > { %2638 = sst [smem:[#allocation10_spill]] %s2200_s22  ;;  %p1669_p7 = scmp.ge.s32.totalorder %s2059_s16, 1 }
   0xf   : > { %s2640_s24 = scalar_select %p2206_p6, 1, 0 }
  0x10   : > { %p418_p8 = scmp.lt.s32.totalorder %s2059_s16, 5 }
  0x11   : > { %2641 = sst [smem:[#allocation11_spill]] %s2640_s24 }
  0x12   : > { %p419_p9 = pnand %p1669_p7, %p418_p8 }
  0x13   : > { %s2629_s25 = sand.u32 (!%p419_p9), 1, %s2051_s30   ;;  %p467_p10 = scmp.lt.s32.totalorder (!%p419_p9), %s2185_s17, 3 }
  0x14   : > { %422 = sbr.rel (%p419_p9) target bundleno = 1776 (0x6f0), region = 72  ;;  %s2216_s26 = sshll.u32 (!%p419_p9), %s2629_s25, 1 }
  0x15   : > { %s466_s24 = scalar_lea.vmem (!%p419_p9), [#allocation3], %s2216_s26  ;;  %p1673_p11 = scmp.ne.s32.totalorder (!%p419_p9), %s2185_s17, 0 }
  0x1b   : > { %s2219_s27 = scalar_select %p467_p10, %s2185_s17, 3 }
  0x1c   : > { %479 = sbr.rel (%p1673_p11) target bundleno = 35 (0x23), region = 76  ;;  %v480_v0 = vld [vmem:[%s2611_s1] sm:$0x1] (!%p1673_p11) }
  0x1d   : > { %s1711_s28 = sshll.u32 %s2219_s27, 4  ;;  %s474_s21 = scalar_lea.vmem %s2623_s13, %s2219_s27  ;;  %481 = vst [vmem:[#allocation2] sm:$0x1] (!%p1673_p11), %v480_v0 }
  0x1e   : > { %s471_s19 = scalar_lea.vmem %s2610_s0, %s1711_s28 }
  0x23 PF: > { %v773_v1 = vld [vmem:[%s471_s19] sm:$0xff]  ;;  %v774_v2 = vld [vmem:[%s471_s19 + $0x8] sm:$0xff]  ;;  %vm799_vm0 = vcmask 130048   ;;  %v2061_v5 = vmov 0   ;;  %v777_v6 = vld [vmem:[%s2616_s6 + $0x10] sm:$0xff]  ;;  %s2062_s14 = smov 2   ;;  %v515_v49 = vlaneseq }
  0x24   : > { %v769_v3 = vld [vmem:[%s2615_s5] sm:$0xff]  ;;  %v1857_v4 = vpack.c.bf16 %v774_v2, %v773_v1  ;;  %1940 = vset.pattern.permute.xlu1 %v2061_v5  ;;  %1939 = vset.pattern.permute.xlu0 %v2061_v5  ;;  %v770_v7 = vld [vmem:[%s2615_s5 + $0x8] sm:$0xff]  ;;  %v771_v9 = vld [vmem:[%s2615_s5 + $0x10] sm:$0xff]  ;;  %s2063_s16 = smov 3   ;;  %s2064_s25 = smov 127   ;;  %v2068_v16 = vmov 1  }
  0x25   : > { %1760 = vmatprep.mubr.msk.f32.mxu0 %vm799_vm0, %v769_v3  ;;  %791 = vperm.xlu1 %1940, %v777_v6   ;;  %v775_v8 = vld [vmem:[%s2616_s6] sm:$0xff]  ;;  %v778_v10 = vld [vmem:[%s2616_s6 + $0x18] sm:$0xff]  ;;  %v776_v11 = vld [vmem:[%s2616_s6 + $0x8] sm:$0xff]  ;;  %s2065_s28 = smov 1   ;;  %s2066_s18 = smov 125   ;;  %v2069_v17 = vmov 2  }
  0x26   : > { %1858 = vmatprep.subr.bf16.mxu0 %v1857_v4  ;;  %781 = vperm.xlu0 %1939, %v775_v8   ;;  %v2258_v12 = vld [vmem:[#allocation2] sm:$0x1]  ;;  %v772_v13 = vld [vmem:[%s2615_s5 + $0x18] sm:$0xff]  ;;  %v624_v14 = vld [vmem:[%s2618_s8 + $0x8] sm:$0xff]  ;;  %s2067_s22 = smov 126   ;;  %v2070_v20 = vmov 4  }
  0x27   : > { %1860 = vmatpush3.bf16.msra.mxu0 %v1857_v4  ;;  %v623_v15 = vld [vmem:[%s2618_s8] sm:$0xff]  ;;  %v625_v18 = vld [vmem:[%s2618_s8 + $0x10] sm:$0xff]  ;;  %v626_v19 = vld [vmem:[%s2618_s8 + $0x18] sm:$0xff]  ;;  %v2071_v21 = vmov 3   ;;  %v2072_v22 = vmov 0.0|0.0   ;;  %vm2073_vm1 = vmmov 0  }
  0x28   : > { %1861 = vmatprep.subr.bf16.mxu1 %v2072_v22  ;;  %v2074_v23 = vmov 0.0   ;;  %v901_v42 = vld [vmem:[%s2617_s7] sm:$0xff]  ;;  %vm908_vm2 = vcmask 261120   ;;  %v902_v43 = vld [vmem:[%s2617_s7 + $0x8] sm:$0xff]  ;;  %v903_v44 = vld [vmem:[%s2617_s7 + $0x10] sm:$0xff]  ;;  %v2349_v50 = vshrl.u32 %v515_v49, 7 }
  0x29   : > { %796 = vperm.xlu1 %1940, %v778_v10   ;;  %1774 = vmatprep.mubr.msk.f32.mxu1 %vm2073_vm1, %v2074_v23  ;;  %v904_v45 = vld [vmem:[%s2617_s7 + $0x18] sm:$0xff]  ;;  %v905_v46 = vld [vmem:[%s2617_s7 + $0x20] sm:$0xff]  ;;  %v906_v47 = vld [vmem:[%s2617_s7 + $0x28] sm:$0xff]  ;;  %v1031_v52 = vand.u32 127, %v515_v49  ;;  %vm1063_vm6 = vcmask 1041408   ;;  %s2075_s29 = smov 9  }
  0x2a   : > { %1761 = vmatmul.mubr.msk.f32.vlgmr.msra.gmra.mrb[0].mxu0 %vm799_vm0, %v770_v7  ;;  %786 = vperm.xlu0 %1939, %v776_v11   ;;  %v907_v48 = vld [vmem:[%s2617_s7 + $0x30] sm:$0xff]  ;;  %v1034_v51 = vmul.u32 64, %v2349_v50  ;;  %v1295_v56 = vld [vmem:[%s2620_s10 + $0x8] sm:$0xff]  ;;  %v1294_v57 = vld [vmem:[%s2620_s10] sm:$0xff]  ;;  %v2076_v61 = vmov 5   ;;  %s2077_s19 = smov 8  }
  0x2b   : > { %1763 = vmatprep.mubr.msk.f32.mxu0 %vm799_vm0, %v771_v9  ;;  %1795 = vmatprep.subr.mxu0 %v2074_v23  ;;  %v1296_v58 = vld [vmem:[%s2620_s10 + $0x10] sm:$0xff]  ;;  %v1297_v59 = vld [vmem:[%s2620_s10 + $0x18] sm:$0xff]  ;;  %v509_v60 = vld [vmem:[%s2622_s12] sm:$0x1]  ;;  %v2080_v62 = vmov 6   ;;  %v2083_v63 = vmov 7  }
  0x2c   : > { %v1036_v53 = vadd.s32 64, %v1034_v51  ;;  %vm1035_vm3 = vcmp.ge.s32.totalorder %v1031_v52, %v1034_v51  ;;  %v2085_v0 = vmov 8   ;;  %v2086_v1 = vmov 9   ;;  %s2646_s27 = sand.u32 1, %s2051_s30  }
  0x2d   : > { %499 = vrot.lane.b32.xlu1 %v2258_v12, %s2062_s14  ;;  %s2078_s14 = smov 7   ;;  %v2087_v2 = vmov 10   ;;  %vm1041_vm7 = vcmask 15360   ;;  %vm1192_vm8 = vcmask 64512   ;;  %vm1566_vm12 = vcmask 189440  }
  0x2e   : > { %1764 = vmatmul.mubr.msk.f32.gmra.mrb[2].mxu0 %vm799_vm0, %v772_v13  ;;  %497 = vrot.lane.b32.xlu0 %v2258_v12, %s2063_s16  ;;  %vm1037_vm4 = vcmp.lt.s32.totalorder %v1031_v52, %v1036_v53  ;;  %s2079_s16 = smov 10  }
  0x2f   : > { %1797 = vmatprep.mubr.msk.f32.mxu0 %vm2073_vm1, %v2074_v23  ;;  %vm2352_vm5 = vmand %vm1035_vm3, %vm1037_vm4 }
  0x30   : > { %v2359_v55 = vsel %vm2352_vm5, 1.0, %v2074_v23 }
  0x31   : > { %503 = vrot.lane.b32.xlu1 %v2258_v12, %s2064_s25  ;;  %1796 = vmatpush3.msk.msra.mxu0 %vm1063_vm6, %v2359_v55  ;;  %s2081_s25 = smov 6  }
  0x32   : > { %501 = vrot.lane.b32.xlu0 %v2258_v12, %s2065_s28  ;;  %s2082_s28 = smov 5  }
  0x35   : > { %507 = vrot.lane.b32.xlu1 %v2258_v12, %s2066_s18  ;;  %s2084_s18 = smov 4  }
  0x36   : > { %505 = vrot.lane.b32.xlu0 %v2258_v12, %s2067_s22  ;;  %s1708_s22 = sshll.u32 %s2185_s17, 5  ;;  %s1572_s17 = scalar_lea.sflag [#allocation4], %s2646_s27 }
  0x39   : > { %634 = vperm.xlu1 %1940, %v624_v14  }
  0x3a   : > { %629 = vperm.xlu0 %1939, %v623_v15  }
  0x3d   : > { %1941 = vset.pattern.permute.xlu1 %v2068_v16 }
  0x3e   : > { %660 = vperm.xlu1 %1941, %v624_v14   ;;  %1943 = vset.pattern.permute.xlu0 %v2069_v17 }
  0x3f   : > { %688 = vperm.xlu0 %1943, %v624_v14  }
  0x42   : > { %1942 = vset.pattern.permute.xlu1 %v2069_v17 }
  0x43   : > { %684 = vperm.xlu1 %1942, %v623_v15   ;;  %1944 = vset.pattern.permute.xlu0 %v2068_v16 }
  0x44   : > { %656 = vperm.xlu0 %1944, %v623_v15  }
  0x47   : > { %1945 = vset.pattern.permute.xlu1 %v2061_v5 }
  0x48   : > { %639 = vperm.xlu1 %1945, %v625_v18   ;;  %664 = vperm.xlu0 %1944, %v625_v18  }
  0x4c   : > { %644 = vperm.xlu1 %1945, %v626_v19   ;;  %1949 = vset.pattern.permute.xlu0 %v2070_v20 }
  0x4d   : > { %742 = vperm.xlu0 %1949, %v623_v15  }
  0x50   : > { %1946 = vset.pattern.permute.xlu1 %v2068_v16 }
  0x51   : > { %668 = vperm.xlu1 %1946, %v626_v19   ;;  %1950 = vset.pattern.permute.xlu0 %v2071_v21 }
  0x52   : > { %718 = vperm.xlu0 %1950, %v624_v14  }
  0x55   : > { %1947 = vset.pattern.permute.xlu1 %v2071_v21 }
  0x56   : > { %714 = vperm.xlu1 %1947, %v623_v15   ;;  %726 = vperm.xlu0 %1950, %v626_v19  }
  0x5a   : > { %1948 = vset.pattern.permute.xlu1 %v2069_v17  ;;  %1954 = vset.pattern.permute.xlu0 %v2061_v5 }
  0x5b   : > { %692 = vperm.xlu1 %1948, %v625_v18   ;;  %1300 = vperm.xlu0 %1954, %v1294_v57  }
  0x5f   : > { %696 = vperm.xlu1 %1948, %v626_v19   ;;  %1315 = vperm.xlu0 %1954, %v1297_v59  }
  0x63   : > { %1951 = vset.pattern.permute.xlu1 %v2070_v20  ;;  %1956 = vset.pattern.permute.xlu0 %v2068_v16 }
  0x64   : > { %746 = vperm.xlu1 %1951, %v624_v14   ;;  %521 = vperm.xlu0 %1956, %v509_v60  }
  0x68   : > { %1952 = vset.pattern.permute.xlu1 %v2071_v21  ;;  %1959 = vset.pattern.permute.xlu0 %v2070_v20 }
  0x69   : > { %722 = vperm.xlu1 %1952, %v625_v18   ;;  %551 = vperm.xlu0 %1959, %v509_v60  }
  0x6d   : > { %1953 = vset.pattern.permute.xlu1 %v2070_v20  ;;  %485 = vrot.lane.b32.xlu0 %v2258_v12, %s2075_s29  ;;  %s1588_s29 = sshll.u32 %s466_s24, 4  ;;  %s2566_s29 = int_to_ptr.vmem [resolvable:$true] %s1588_s29 }
  0x6e   : > { %750 = vperm.xlu1 %1953, %v625_v18   ;;  %1966 = vset.pattern.permute.xlu0 %v2061_v5  ;;  %v1188_v18 = vld [vmem:[%s2619_s9] sm:$0xff] }
  0x71   : > { %487 = vrot.lane.b32.xlu0 %v2258_v12, %s2077_s19 }
  0x72   : > { %754 = vperm.xlu1 %1953, %v626_v19   ;;  %v2414_v19 = vsub.s32 0, %v2349_v50 }
  0x75   : > { %489 = vrot.lane.b32.xlu0 %v2258_v12, %s2078_s14 }
  0x76   : > { %1955 = vset.pattern.permute.xlu1 %v2061_v5 }
  0x77   : > { %1305 = vperm.xlu1 %1955, %v1295_v56  }
  0x79   : > { %491 = vrot.lane.b32.xlu0 %v2258_v12, %s2081_s25 }
  0x7b   : > { %1310 = vperm.xlu1 %1955, %v1296_v58  }
  0x7d   : > { %493 = vrot.lane.b32.xlu0 %v2258_v12, %s2082_s28 }
  0x7f   : > { %512 = vperm.xlu1 %1955, %v509_v60  }
  0x81   : > { %495 = vrot.lane.b32.xlu0 %v2258_v12, %s2084_s18  ;;  %s2088_s18 = smov [#allocation3]  }
  0x82   : > { %s2001_s20 = sshll.u32 %s2088_s18, 4  ;;  %s2002_s20 = int_to_ptr.vmem [resolvable:$false] %s2001_s20 }
  0x83   : > { %1957 = vset.pattern.permute.xlu1 %v2069_v17  ;;  %s2003_s15 = scalar_lea.vmem %s2002_s20, 64  ;;  %p2004_p1 = scmp.lt.s32.totalorder %s2566_s29, %s2002_s20 }
  0x84   : > { %531 = vperm.xlu1 %1957, %v509_v60  }
  0x88   : > { %1958 = vset.pattern.permute.xlu1 %v2071_v21 }
  0x89   : > { %541 = vperm.xlu1 %1958, %v509_v60  }
  0x8d   : > { %1960 = vset.pattern.permute.xlu1 %v2076_v61 }
  0x8e   : > { %561 = vperm.xlu1 %1960, %v509_v60  }
  0x92   : > { %483 = vrot.lane.b32.xlu1 %v2258_v12, %s2079_s16  ;;  %s2644_s16 = sld [smem:[#allocation12_spill]] }
  0x93   : > { %1961 = vset.pattern.permute.xlu1 %v2080_v62 }
  0x96   : > { %571 = vperm.xlu1 %1961, %v509_v60  }
  0x98   : > { %s2645_s25 = smov %s2644_s16  ;;  %s2564_s28 = scalar_lea.hbm %s2644_s16, %s1708_s22 }
  0x9a   : > { %1962 = vset.pattern.permute.xlu1 %v2083_v63 }
  0x9b   : > { %581 = vperm.xlu1 %1962, %v509_v60  }
  0x9f   : > { %1963 = vset.pattern.permute.xlu1 %v2085_v0  ;;  %v1189_v0 = vld [vmem:[%s2619_s9 + $0x8] sm:$0xff] }
  0xa0   : > { %591 = vperm.xlu1 %1963, %v509_v60  }
  0xa4   : > { %v792_v25 = vpop.permute.xlu1 %791  ;;  %1964 = vset.pattern.permute.xlu1 %v2086_v1  ;;  %v1190_v1 = vld [vmem:[%s2619_s9 + $0x10] sm:$0xff] }
  0xa5   : > { %v782_v24 = vpop.permute.xlu0 %781  ;;  %601 = vperm.xlu1 %1964, %v509_v60  }
  0xa8   : > { %v797_v31 = vpop.permute.xlu1 %796 }
  0xa9   : > { %v787_v26 = vpop.permute.xlu0 %786  ;;  %1965 = vset.pattern.permute.xlu1 %v2087_v2  ;;  %v1191_v2 = vld [vmem:[%s2619_s9 + $0x18] sm:$0xff] }
  0xaa   : > { %611 = vperm.xlu1 %1965, %v509_v60  }
  0xad   : > { %v2416_v20 = vpop.permute.xlu0 %497 }
  0xfd   : > { %v1762_v27 = vpop.f32.mrb[0].mxu0 }
  0xfe   : > { %v884_v28 = vadd.f32 %v1762_v27, %v787_v26  ;;  %v878_v29 = vpop.f32.mrb[1].mxu0  ;;  %v2420_v26 = vpop.permute.xlu1 %499 }
  0xff   : > { %v879_v30 = vadd.f32 %v878_v29, %v782_v24  ;;  %v1170_v24 = vrot.slane %v2416_v20, %v2414_v19  ;;  %v2424_v27 = vrot.slane %v2420_v26, %v2414_v19 }
 0x100   : > { %1975 = vtanh.f32 %v884_v28 }
 0x101   : > { %1977 = vtanh.f32 %v879_v30  ;;  %v1765_v32 = vpop.f32.mrb[2].mxu0 }
 0x102   : > { %v894_v33 = vadd.f32 %v1765_v32, %v797_v31  ;;  %v888_v34 = vpop.f32.mrb[3].mxu0  ;;  %v2427_v32 = vpop.permute.xlu0 %501 }
 0x103   : > { %v889_v35 = vadd.f32 %v888_v34, %v792_v25 }
 0x104   : > { %1979 = vtanh.f32 %v894_v33  ;;  %v2431_v33 = vrot.slane %v2427_v32, %v2414_v19 }
 0x105   : > { %1981 = vtanh.f32 %v889_v35 }
 0x106   : > { %v506_v49 = vpop.permute.xlu0 %505 }
 0x107   : > { %v2444_v50 = vrot.slane %v506_v49, %v2414_v19 }
 0x10a   : > { %v1976_v36 = vpop.eup %1975 }
 0x10b   : > { %v1978_v37 = vpop.eup %1977 }
 0x10c   : > { %v1862_v38 = vpack.c.bf16 %v1976_v36, %v1978_v37 }
 0x10e   : > { %v1980_v39 = vpop.eup %1979  ;;  %1863 = vmatpush3.bf16.msra.mxu1 %v1862_v38  ;;  %v2436_v38 = vrot.slane %v2258_v12, %v2414_v19 }
 0x10f   : > { %v1982_v40 = vpop.eup %1981  ;;  %1864 = vmatprep.subr.bf16.mxu1 %v2072_v22 }
 0x110   : > { %v1865_v41 = vpack.c.bf16 %v1980_v39, %v1982_v40 }
 0x112   : > { %1866 = vmatpush3.bf16.msra.mxu1 %v1865_v41 }
 0x113   : > { %1837 = vmatprep.subr.bf16.mxu1 %v2074_v23 }
 0x115   : > { %1775 = vmatmul.mubr.msk.f32.vlgmr.msra.gmra.mrb[0].mxu1 %vm908_vm2, %v901_v42 }
 0x116   : > { %1777 = vmatprep.mubr.msk.f32.mxu1 %vm2073_vm1, %v2074_v23 }
 0x119   : > { %1778 = vmatmul.mubr.msk.f32.gmra.mrb[2].mxu1 %vm908_vm2, %v902_v43  ;;  %v504_v43 = vpop.permute.xlu1 %503 }
 0x11a   : > { %1780 = vmatprep.mubr.msk.f32.mxu1 %vm2073_vm1, %v2074_v23 }
 0x11d   : > { %1781 = vmatmul.mubr.msk.f32.gmra.mrb[4].mxu1 %vm908_vm2, %v903_v44  ;;  %v2440_v44 = vrot.slane %v504_v43, %v2414_v19  ;;  %v508_v52 = vpop.permute.xlu1 %507 }
 0x11e   : > { %1783 = vmatprep.mubr.msk.f32.mxu1 %vm2073_vm1, %v2074_v23  ;;  %v1185_v56 = vrot.slane %v508_v52, %v2414_v19 }
 0x121   : > { %1784 = vmatmul.mubr.msk.f32.gmra.mrb[6].mxu1 %vm908_vm2, %v904_v45 }
 0x122   : > { %1786 = vmatprep.mubr.msk.f32.mxu1 %vm2073_vm1, %v2074_v23 }
 0x125   : > { %1787 = vmatmul.mubr.msk.f32.gmra.mrb[8].mxu1 %vm908_vm2, %v905_v46 }
 0x126   : > { %1789 = vmatprep.mubr.msk.f32.mxu1 %vm2073_vm1, %v2074_v23 }
 0x129   : > { %1790 = vmatmul.mubr.msk.f32.gmra.mrb[10].mxu1 %vm908_vm2, %v906_v47 }
 0x12a   : > { %1792 = vmatprep.mubr.msk.f32.mxu1 %vm2073_vm1, %v2074_v23 }
 0x12d   : > { %1793 = vmatmul.mubr.msk.f32.gmra.mrb[12].mxu1 %vm908_vm2, %v907_v48 }
 0x12e   : > { %1853 = vmatprep.mubr.msk.bf16.mxu1 %vm2073_vm1, %v2074_v23 }
 0x1e8   : > { %v996_v3 = vpop.f32.mrb[0].mxu1 }
 0x1e9   : > { %v1776_v4 = vpop.f32.mrb[1].mxu1  ;;  %1798 = vmatmul.mubr.msk.f32.vlgmr.msra.gmra.mrb[4].mxu0 %vm1041_vm7, %v996_v3  ;;  %v635_v3 = vpop.permute.xlu1 %634 }
 0x1ea   : > { %1800 = vmatprep.mubr.msk.f32.mxu0 %vm2073_vm1, %v2074_v23 }
 0x1ec   : > { %v1001_v5 = vpop.f32.mrb[2].mxu1 }
 0x1ed   : > { %v1779_v6 = vpop.f32.mrb[3].mxu1  ;;  %1801 = vmatmul.mubr.msk.f32.gmra.mrb[6].mxu0 %vm1041_vm7, %v1001_v5  ;;  %v661_v4 = vpop.permute.xlu1 %660 }
 0x1ee   : > { %1803 = vmatprep.mubr.msk.f32.mxu0 %vm2073_vm1, %v2074_v23 }
 0x1f0   : > { %v1006_v7 = vpop.f32.mrb[4].mxu1 }
 0x1f1   : > { %v1782_v8 = vpop.f32.mrb[5].mxu1  ;;  %1804 = vmatmul.mubr.msk.f32.gmra.mrb[8].mxu0 %vm1041_vm7, %v1006_v7  ;;  %v685_v5 = vpop.permute.xlu1 %684 }
 0x1f2   : > { %1806 = vmatprep.mubr.msk.f32.mxu0 %vm2073_vm1, %v2074_v23 }
 0x1f4   : > { %v1011_v9 = vpop.f32.mrb[6].mxu1 }
 0x1f5   : > { %v1785_v10 = vpop.f32.mrb[7].mxu1  ;;  %1807 = vmatmul.mubr.msk.f32.gmra.mrb[10].mxu0 %vm1041_vm7, %v1011_v9  ;;  %v640_v6 = vpop.permute.xlu1 %639 }
 0x1f6   : > { %1809 = vmatprep.mubr.msk.f32.mxu0 %vm2073_vm1, %v2074_v23  ;;  %v630_v9 = vpop.permute.xlu0 %629 }
 0x1f8   : > { %v1016_v11 = vpop.f32.mrb[8].mxu1 }
 0x1f9   : > { %v1788_v13 = vpop.f32.mrb[9].mxu1  ;;  %1810 = vmatmul.mubr.msk.f32.gmra.mrb[12].mxu0 %vm1041_vm7, %v1016_v11  ;;  %v645_v7 = vpop.permute.xlu1 %644 }
 0x1fa   : > { %1812 = vmatprep.mubr.msk.f32.mxu0 %vm2073_vm1, %v2074_v23  ;;  %v689_v11 = vpop.permute.xlu0 %688 }
 0x1fc   : > { %v1021_v14 = vpop.f32.mrb[10].mxu1 }
 0x1fd   : > { %v1791_v15 = vpop.f32.mrb[11].mxu1  ;;  %1813 = vmatmul.mubr.msk.f32.gmra.mrb[14].mxu0 %vm1041_vm7, %v1021_v14  ;;  %v669_v8 = vpop.permute.xlu1 %668 }
 0x1fe   : > { %1815 = vmatprep.mubr.msk.f32.mxu0 %vm2073_vm1, %v2074_v23  ;;  %v657_v14 = vpop.permute.xlu0 %656 }
 0x200   : > { %v1026_v16 = vpop.f32.mrb[12].mxu1 }
 0x201   : > { %v1794_v17 = vpop.f32.mrb[13].mxu1  ;;  %1816 = vmatmul.mubr.msk.f32.gmra.mrb[16].mxu0 %vm1041_vm7, %v1026_v16  ;;  %v715_v10 = vpop.permute.xlu1 %714 }
 0x202   : > { %1820 = vmatprep.mubr.msk.f32.mxu0 %vm1192_vm8, %v1188_v18  ;;  %v665_v16 = vpop.permute.xlu0 %664  ;;  %v733_v49 = vmul.f32 %v2440_v44, %v715_v10 }
 0x205   : > { %v693_v13 = vpop.permute.xlu1 %692 }
 0x206   : > { %v743_v18 = vpop.permute.xlu0 %742  ;;  %v707_v52 = vmul.f32 %v2436_v38, %v693_v13 }
 0x209   : > { %v697_v15 = vpop.permute.xlu1 %696 }
 0x20d   : > { %v747_v17 = vpop.permute.xlu1 %746 }
 0x2bc   : > { %v1133_v21 = vpop.f32.mrb[4].mxu0 }
 0x2bd   : > { %v1799_v25 = vpop.f32.mrb[5].mxu0  ;;  %v1171_v29 = vmul.f32 %v1170_v24, %v1133_v21  ;;  %v652_v21 = vmul.f32 %v2424_v27, %v635_v3  ;;  %v676_v24 = vmul.f32 %v2431_v33, %v661_v4 }
 0x2be   : > { %v723_v25 = vpop.permute.xlu1 %722 }
 0x2c0   : > { %v1138_v28 = vpop.f32.mrb[6].mxu0 }
 0x2c1   : > { %v1172_v30 = vmul.f32 %v1138_v28, %v2424_v27  ;;  %v1802_v31 = vpop.f32.mrb[7].mxu0  ;;  %v651_v28 = vmul.f32 %v2424_v27, %v630_v9 }
 0x2c2   : > { %v680_v31 = vadd.f32 %v676_v24, %v652_v21 }
 0x2c3   : > { %v1173_v34 = vadd.f32 %v1172_v30, %v1171_v29  ;;  %v675_v29 = vmul.f32 %v2431_v33, %v657_v14  ;;  %v654_v30 = vmul.f32 %v2424_v27, %v645_v7 }
 0x2c4   : > { %v1143_v35 = vpop.f32.mrb[8].mxu0 }
 0x2c5   : > { %v1174_v36 = vmul.f32 %v1143_v35, %v2431_v33  ;;  %v1805_v37 = vpop.f32.mrb[9].mxu0  ;;  %v678_v35 = vmul.f32 %v2431_v33, %v669_v8 }
 0x2c6   : > { %v653_v37 = vmul.f32 %v2424_v27, %v640_v6 }
 0x2c7   : > { %v1175_v39 = vadd.f32 %v1174_v36, %v1173_v34  ;;  %v706_v34 = vmul.f32 %v2436_v38, %v689_v11  ;;  %v705_v36 = vmul.f32 %v2436_v38, %v685_v5 }
 0x2c8   : > { %v1148_v40 = vpop.f32.mrb[10].mxu0 }
 0x2c9   : > { %v1176_v41 = vmul.f32 %v1148_v40, %v2436_v38  ;;  %v1808_v42 = vpop.f32.mrb[11].mxu0  ;;  %v677_v40 = vmul.f32 %v2431_v33, %v665_v16  ;;  %v710_v43 = vadd.f32 %v706_v34, %v680_v31 }
 0x2ca   : > { %v751_v42 = vpop.permute.xlu1 %750 }
 0x2cb   : > { %v1177_v45 = vadd.f32 %v1176_v41, %v1175_v39  ;;  %v679_v39 = vadd.f32 %v675_v29, %v651_v28  ;;  %v719_v41 = vpop.permute.xlu0 %718 }
 0x2cc   : > { %v1153_v46 = vpop.f32.mrb[12].mxu0 }
 0x2cd   : > { %v1178_v47 = vmul.f32 %v1153_v46, %v2440_v44  ;;  %v1811_v48 = vpop.f32.mrb[13].mxu0  ;;  %v708_v46 = vmul.f32 %v2436_v38, %v697_v15  ;;  %v763_v38 = vmul.f32 %v2444_v50, %v751_v42 }
 0x2ce   : > { %v709_v48 = vadd.f32 %v705_v36, %v679_v39  ;;  %v755_v33 = vpop.permute.xlu1 %754 }
 0x2cf   : > { %v1179_v51 = vadd.f32 %v1178_v47, %v1177_v45  ;;  %v682_v45 = vadd.f32 %v678_v35, %v654_v30  ;;  %v734_v47 = vmul.f32 %v2440_v44, %v719_v41  ;;  %v1326_v35 = vld [vmem:[%s2621_s11] sm:$0x1] }
 0x2d0   : > { %v1158_v53 = vpop.f32.mrb[14].mxu0 }
 0x2d1   : > { %v1180_v57 = vmul.f32 %v1158_v53, %v2444_v50  ;;  %v1814_v58 = vpop.f32.mrb[15].mxu0  ;;  %v727_v53 = vpop.permute.xlu0 %726  ;;  %v738_v27 = vadd.f32 %v734_v47, %v710_v43 }
 0x2d2   : > { %v736_v58 = vmul.f32 %v2440_v44, %v727_v53  ;;  %v1306_v6 = vpop.permute.xlu1 %1305 }
 0x2d3   : > { %v1181_v59 = vadd.f32 %v1180_v57, %v1179_v51  ;;  %v681_v51 = vadd.f32 %v677_v40, %v653_v37  ;;  %v762_v57 = vmul.f32 %v2444_v50, %v747_v17 }
 0x2d4   : > { %v1163_v60 = vpop.f32.mrb[16].mxu0 }
 0x2d5   : > { %v1186_v61 = vmul.f32 %v1185_v56, %v1163_v60  ;;  %v1817_v62 = vpop.f32.mrb[17].mxu0  ;;  %v712_v56 = vadd.f32 %v708_v46, %v682_v45  ;;  %v711_v60 = vadd.f32 %v707_v52, %v681_v51  ;;  %v1301_v3 = vpop.permute.xlu0 %1300 }
 0x2d6   : > { %v735_v62 = vmul.f32 %v2440_v44, %v723_v25  ;;  %v1311_v21 = vpop.permute.xlu1 %1310 }
 0x2d7   : > { %v1187_v63 = vadd.f32 %v1186_v61, %v1181_v59  ;;  %v737_v59 = vadd.f32 %v733_v49, %v709_v48  ;;  %v761_v61 = vmul.f32 %v2444_v50, %v743_v18 }
 0x2d9   : > { %1818 = vmatprep.subr.mxu0 %v1187_v63  ;;  %v765_v5 = vadd.f32 %v761_v61, %v737_v59  ;;  %v1316_v17 = vpop.permute.xlu0 %1315 }
 0x2da   : > { %1819 = vmatpush3.msra.mxu0 %v1187_v63  ;;  %v764_v63 = vmul.f32 %v2444_v50, %v755_v33  ;;  %v513_v36 = vpop.permute.xlu1 %512 }
 0x2db   : > { %1821 = vmatmul.mubr.msk.f32.vlgmr.msra.gmra.mrb[18].mxu0 %vm1192_vm8, %v1189_v0  ;;  %1867 = vmatprep.subr.bf16.mxu0 %v2072_v22  ;;  %v740_v0 = vadd.f32 %v736_v58, %v712_v56  ;;  %v518_v46 = vrot.slane %v513_v36, %v2414_v19 }
 0x2dc   : > { %1823 = vmatprep.mubr.msk.f32.mxu0 %vm1192_vm8, %v1190_v1  ;;  %v766_v1 = vadd.f32 %v762_v57, %v738_v27 }
 0x2dd   : > { %v768_v11 = vadd.f32 %v764_v63, %v740_v0  ;;  %v522_v37 = vpop.permute.xlu0 %521 }
 0x2de   : > { %v532_v39 = vpop.permute.xlu1 %531 }
 0x2df   : > { %1824 = vmatmul.mubr.msk.f32.gmra.mrb[20].mxu0 %vm1192_vm8, %v1191_v2  ;;  %v739_v2 = vadd.f32 %v735_v62, %v711_v60  ;;  %v537_v49 = vrot.slane %v532_v39, %v2414_v19 }
 0x2e0   : > { %1834 = vmatprep.mubr.msk.f32.mxu0 %vm2073_vm1, %v2074_v23 }
 0x2e1   : > { %v767_v15 = vadd.f32 %v763_v38, %v739_v2  ;;  %v552_v40 = vpop.permute.xlu0 %551 }
 0x2e2   : > { %v542_v41 = vpop.permute.xlu1 %541  ;;  %v557_v58 = vrot.slane %v552_v40, %v2414_v19 }
 0x2e3   : > { %v547_v53 = vrot.slane %v542_v41, %v2414_v19 }
 0x2e5   : > { %v486_v42 = vpop.permute.xlu0 %485 }
 0x2e6   : > { %v562_v43 = vpop.permute.xlu1 %561 }
 0x2e7   : > { %v567_v63 = vrot.slane %v562_v43, %v2414_v19 }
 0x2e9   : > { %v488_v45 = vpop.permute.xlu0 %487 }
 0x2ea   : > { %v484_v47 = vpop.permute.xlu1 %483  ;;  %v538_v56 = vmul.f32 %v537_v49, %v488_v45 }
 0x2eb   : > { %v519_v52 = vmul.f32 %v518_v46, %v484_v47 }
 0x2ed   : > { %v490_v48 = vpop.permute.xlu0 %489 }
 0x2ee   : > { %v572_v57 = vpop.permute.xlu1 %571  ;;  %v548_v60 = vmul.f32 %v547_v53, %v490_v48  ;;  %v1967_v53 = vld [vmem:[%s2614_s4] sm:$0xff]  }
 0x2ef   : > { %v577_v2 = vrot.slane %v572_v57, %v2414_v19  ;;  %1838 = vmatpush3.bf16.msra.mxu1 %v1967_v53  ;;  %v1970_v57 = vld [vmem:[%s2614_s4 + $0x18] sm:$0xff]  }
 0x2f0   : > { %1839 = vmatprep.subr.bf16.mxu1 %v2074_v23 }
 0x2f1   : > { %v492_v33 = vpop.permute.xlu0 %491 }
 0x2f2   : > { %v582_v61 = vpop.permute.xlu1 %581 }
 0x2f5   : > { %v494_v62 = vpop.permute.xlu0 %493 }
 0x3ae   : > { %v1822_v4 = vpop.f32.mrb[18].mxu0 }
 0x3af   : > { %v1291_v7 = vadd.f32 %v1822_v4, %v766_v1  ;;  %v1271_v8 = vpop.f32.mrb[19].mxu0  ;;  %v558_v1 = vmul.f32 %v557_v58, %v492_v33  ;;  %v592_v4 = vpop.permute.xlu1 %591  ;;  %v1971_v33 = vld [vmem:[%s2614_s4 + $0x20] sm:$0xff]   ;;  %v1972_v58 = vld [vmem:[%s2614_s4 + $0x28] sm:$0xff]  }
 0x3b0   : > { %v1290_v9 = vadd.f32 %v1271_v8, %v765_v5  ;;  %v496_v5 = vpop.permute.xlu0 %495 }
 0x3b1   : > { %v1319_v10 = vadd.f32 %v1306_v6, %v1291_v7  ;;  %v587_v6 = vrot.slane %v582_v61, %v2414_v19  ;;  %v578_v8 = vmul.f32 %v577_v2, %v496_v5 }
 0x3b2   : > { %v1318_v13 = vadd.f32 %v1301_v3, %v1290_v9  ;;  %v1825_v14 = vpop.f32.mrb[20].mxu0  ;;  %v568_v3 = vmul.f32 %v567_v63, %v494_v62 }
 0x3b3   : > { %1983 = vtanh.f32 %v1319_v10  ;;  %v1293_v44 = vadd.f32 %v1825_v14, %v768_v11  ;;  %v1281_v16 = vpop.f32.mrb[21].mxu0  ;;  %v602_v9 = vpop.permute.xlu1 %601  ;;  %v588_v10 = vmul.f32 %v587_v6, %v2416_v20  ;;  %v597_v11 = vrot.slane %v592_v4, %v2414_v19 }
 0x3b4   : > { %1985 = vtanh.f32 %v1318_v13  ;;  %v1292_v18 = vadd.f32 %v1281_v16, %v767_v15 }
 0x3b5   : > { %v1321_v50 = vadd.f32 %v1316_v17, %v1293_v44  ;;  %v598_v14 = vmul.f32 %v597_v11, %v2420_v26  ;;  %v607_v44 = vrot.slane %v602_v9, %v2414_v19  ;;  %v1400_v26 = vld [vmem:[%s2612_s2] sm:$0x1] }
 0x3b6   : > { %v1320_v24 = vadd.f32 %v1311_v21, %v1292_v18  ;;  %vm1401_vm9 = vcmp.gt.f32.partialorder %v1400_v26, 0.0 }
 0x3b7   : > { %1987 = vtanh.f32 %v1321_v50  ;;  %v612_v16 = vpop.permute.xlu1 %611  ;;  %v608_v18 = vmul.f32 %v607_v44, %v2427_v32 }
 0x3b8   : > { %1989 = vtanh.f32 %v1320_v24  ;;  %v617_v21 = vrot.slane %v612_v16, %v2414_v19 }
 0x3ba   : > { %v618_v24 = vmul.f32 %v617_v21, %v2258_v12 }
 0x3bd   : > { %v1984_v25 = vpop.eup %1983 }
 0x3be   : > { %v1986_v28 = vpop.eup %1985 }
 0x3bf   : > { %v1868_v29 = vpack.c.bf16 %v1984_v25, %v1986_v28 }
 0x3c1   : > { %v1988_v30 = vpop.eup %1987  ;;  %1869 = vmatpush3.bf16.msra.mxu0 %v1868_v29 }
 0x3c2   : > { %v1990_v31 = vpop.eup %1989  ;;  %1870 = vmatprep.subr.bf16.mxu0 %v2072_v22  ;;  %v527_v22 = vrot.slane %v522_v37, %v2414_v19 }
 0x3c3   : > { %v1871_v34 = vpack.c.bf16 %v1988_v30, %v1990_v31 }
 0x3c4   : > { %v528_v51 = vmul.f32 %v527_v22, %v486_v42 }
 0x3c5   : > { %1872 = vmatpush3.bf16.msra.mxu0 %v1871_v34 }
 0x3c6   : > { %v529_v27 = vadd.f32 %v528_v51, %v519_v52 }
 0x3c8   : > { %1835 = vmatmul.mubr.msk.f32.vlgmr.msra.gmra.mrb[22].mxu0 %vm908_vm2, %v1326_v35  ;;  %v539_v59 = vadd.f32 %v538_v56, %v529_v27  ;;  %v1968_v56 = vld [vmem:[%s2614_s4 + $0x8] sm:$0xff]   ;;  %v1969_v27 = vld [vmem:[%s2614_s4 + $0x10] sm:$0xff]  }
 0x3c9   : > { %1840 = vmatpush3.bf16.msra.mxu1 %v1968_v56 }
 0x3ca   : > { %v549_v0 = vadd.f32 %v548_v60, %v539_v59  ;;  %1841 = vmatprep.subr.bf16.mxu1 %v2074_v23  ;;  %v1973_v59 = vld [vmem:[%s2614_s4 + $0x30] sm:$0xff]   ;;  %v1974_v60 = vld [vmem:[%s2614_s4 + $0x38] sm:$0xff]  }
 0x3cc   : > { %v559_v38 = vadd.f32 %v558_v1, %v549_v0 }
 0x3cd   : > { %1842 = vmatpush3.bf16.msra.mxu1 %v1969_v27 }
 0x3ce   : > { %v569_v7 = vadd.f32 %v568_v3, %v559_v38  ;;  %1843 = vmatprep.subr.bf16.mxu1 %v2074_v23 }
 0x3d0   : > { %v579_v13 = vadd.f32 %v578_v8, %v569_v7  ;;  %v1449_v8 = vld [vmem:[%s2613_s3] sm:$0x1] }
 0x3d1   : > { %1844 = vmatpush3.bf16.msra.mxu1 %v1970_v57  ;;  %vm1450_vm11 = vcmp.gt.f32.partialorder %v1449_v8, 0.0 }
 0x3d2   : > { %v589_v15 = vadd.f32 %v588_v10, %v579_v13  ;;  %1845 = vmatprep.subr.bf16.mxu1 %v2074_v23 }
 0x3d4   : > { %v599_v17 = vadd.f32 %v598_v14, %v589_v15 }
 0x3d5   : > { %1846 = vmatpush3.bf16.msra.mxu1 %v1971_v33 }
 0x3d6   : > { %v609_v50 = vadd.f32 %v608_v18, %v599_v17  ;;  %1847 = vmatprep.subr.bf16.mxu1 %v2074_v23 }
 0x3d8   : > { %v619_v25 = vadd.f32 %v618_v24, %v609_v50 }
 0x3d9   : > { %1848 = vmatpush3.bf16.msra.mxu1 %v1972_v58 }
 0x3da   : > { %v620_v28 = vmax.f32 %v619_v25, 1e-06  ;;  %1849 = vmatprep.subr.bf16.mxu1 %v2074_v23 }
 0x3dc   : > { %1991 = vlog2.f32 %v620_v28 }
 0x3dd   : > { %1850 = vmatpush3.bf16.msra.mxu1 %v1973_v59 }
 0x3de   : > { %1851 = vmatprep.subr.bf16.mxu1 %v2074_v23 }
 0x3e1   : > { %1852 = vmatpush3.bf16.msra.mxu1 %v1974_v60 }
 0x3e6   : > { %v1992_v20 = vpop.eup %1991 }
 0x3e7   : > { %v622_v29 = vmul.f32 0.6931472, %v1992_v20 }
 0x49b   : > { %v1396_v30 = vpop.f32.mrb[22].mxu0 }
 0x49c   : > { %v1397_v31 = vadd.f32 %v1396_v30, %v622_v29  ;;  %v1836_v34 = vpop.f32.mrb[23].mxu0 }
 0x49e   : > { %v1402_v35 = vsel %vm1401_vm9, %v1397_v31, -1e+30 }
 0x49f   : > { %v1407_v32 = vrot.slane %v1402_v35, %v2414_v19 }
 0x4a1   : > { %v1409_v36 = vsel %vm2352_vm5, %v1407_v32, -1e+30 }
 0x4a2   : > { %v1410_v12 = vsel %vm1063_vm6, %v1409_v36, -inf }
 0x4a3   : > { %1411 = vmax.xlane.f32.xlu1 %v1410_v12 }
 0x530   : > { %v1412_v37 = vpop.xlane.xlu1 %1411 }
 0x531   : > { %v1413_v39 = vmul.f32 %v2359_v55, %v1412_v37 }
 0x533   : > { %v1414_v40 = vsel %vm1063_vm6, %v1413_v39, 0.0 }
 0x534   : > { %v1415_v41 = vrot.slane %v1414_v40, 4 }
 0x536   : > { %v1416_v42 = vadd.f32 %v1415_v41, %v1414_v40 }
 0x538   : > { %v1417_v43 = vrot.slane %v1416_v42, 2 }
 0x53a   : > { %v1418_v45 = vadd.f32 %v1417_v43, %v1416_v42 }
 0x53c   : > { %v1419_v46 = vrot.slane %v1418_v45, 1 }
 0x53e   : > { %v1420_v22 = vadd.f32 %v1419_v46, %v1418_v45 }
 0x540   : > { %v1421_v47 = vsub.f32 %v1402_v35, %v1420_v22 }
 0x542   : > { %v1422_v48 = vmul.f32 1.442695, %v1421_v47 }
 0x544   : > { %1993 = vpow2.f32 %v1422_v48 }
 0x54e   : > { %v1994_v49 = vpop.eup %1993 }
 0x54f   : > { %v1428_v54 = vrot.slane %v1994_v49, %v2414_v19 }
 0x551   : > { %v1430_v51 = vmul.f32 %v2359_v55, %v1428_v54 }
 0x553   : > { %v1431_v52 = vsel %vm1063_vm6, %v1430_v51, 0.0 }
 0x554   : > { %1432 = vadd.xlane.f32.xlu0 %v1431_v52 }
 0x5e1   : > { %v1433_v61 = vpop.xlane.xlu0 %1432 }
 0x5e2   : > { %vm1434_vm10 = vcmp.gt.f32.partialorder %v1433_v61, 0.0 }
 0x5e3   : > { %v1435_v62 = vsel %vm1434_vm10, %v1433_v61, 1.0 }
 0x5e4   : > { %1995 = vrcp.f32 %v1435_v62 }
 0x5ee   : > { %v1996_v63 = vpop.eup %1995 }
 0x5ef   : > { %v1437_v0 = vmul.f32 %v1996_v63, %v1435_v62 }
 0x5f1   : > { %v1438_v1 = vsub.f32 2.0, %v1437_v0 }
 0x5f3   : > { %v1439_v2 = vmul.f32 %v1996_v63, %v1438_v1 }
 0x5f5   : > { %v1440_v38 = vmul.f32 %v2359_v55, %v1439_v2 }
 0x5f7   : > { %v1441_v3 = vsel %vm1063_vm6, %v1440_v38, 0.0 }
 0x5f8   : > { %v1442_v4 = vrot.slane %v1441_v3, 4 }
 0x5fa   : > { %v1443_v5 = vadd.f32 %v1442_v4, %v1441_v3 }
 0x5fc   : > { %v1444_v6 = vrot.slane %v1443_v5, 2 }
 0x5fe   : > { %v1445_v23 = vadd.f32 %v1444_v6, %v1443_v5 }
 0x600   : > { %v1446_v7 = vrot.slane %v1445_v23, 1 }
 0x602   : > { %v1447_v9 = vadd.f32 %v1446_v7, %v1445_v23 }
 0x604   : > { %v1448_v10 = vmul.f32 %v1994_v49, %v1447_v9 }
 0x606   : > { %v1451_v11 = vsel %vm1450_vm11, %v1448_v10, 1e-08 }
 0x607   : > { %1452 = vst [vmem:[#allocation2] sm:$0x1] %v1451_v11  ;;  %1453 = vst [vmem:[%s474_s21] sm:$0x1] %v1451_v11  ;;  %v1458_v13 = vrot.slane %v1451_v11, %v2414_v19  ;;  %s1997_s21 = scalar_lea.vmem %s2566_s29, 32 }
 0x608   : > { %p1998_p12 = scmp.ne.s32.totalorder %s2566_s29, %s1997_s21  ;;  %p2005_p2 = scmp.lt.s32.totalorder %s2003_s15, %s1997_s21 }
 0x609   : > { %v1460_v14 = vmul.f32 %v2359_v55, %v1458_v13 }
 0x60a   : > { %p1999_p13 = pnand %p1998_p12, %p2202_p5  ;;  %p2006_p3 = por %p2005_p2, %p2004_p1 }
 0x60b   : > { %v1461_v15 = vpack.c.bf16 %v1460_v14, %v1460_v14 }
 0x60c   : > { %p2000_p0 = pneg %p1999_p13 }
 0x60d   : > { %1854 = vmatmul.mubr.bf16.vlgmr.msra.gmra.mrb[16].mxu1 %v1461_v15 }
 0x60e   : > { %p2007_p4 = pnand %p2006_p3, %p2000_p0 }
 0x6e0   : > { %v1560_v19 = vpop.f32.mrb[16].mxu1 }
 0x6e1   : > { %1567 = vst.msk [vmem:[%s466_s24] sm:$0x3] %vm1566_vm12, %v1560_v19  ;;  %v1855_v55 = vpop.f32.mrb[17].mxu1 }
 0x6e2   : > { %v1563_v44 = vpop.f32.mrb[18].mxu1 }
 0x6e3   : > { %2010 = shalt.err (!%p2007_p4)
}
 0x6e4   : > { %s2011_s24 = scalar_lea.hbm %s2564_s28, 32  ;;  %s2015_s19 = scalar_lea.hbm %s2645_s25, 128 }
 0x6e5   : > { %p2012_p7 = scmp.ne.s32.totalorder %s2564_s28, %s2011_s24  ;;  %p2016_p10 = scmp.lt.u32.totalorder %s2564_s28, %s2645_s25 }
 0x6e6   : > { %p2017_p11 = scmp.lt.u32.totalorder %s2015_s19, %s2011_s24  ;;  %p2019_p13 = scmp.lt.u32.totalorder %s2011_s24, %s2564_s28 }
 0x6e7   : > { %p2013_p8 = pnand %p2012_p7, %p2202_p5 }
 0x6e8   : > { %p2018_p12 = por %p2017_p11, %p2016_p10 }
 0x6e9   : > { %p2014_p9 = pneg %p2013_p8 }
 0x6ea   : > { %p2020_p0 = por %p2019_p13, %p2018_p12 }
 0x6ec   : > { %p2021_p1 = pnand %p2020_p0, %p2014_p9 }
 0x6ee   : > { %2024 = shalt.err (!%p2021_p1)
}
 0x6ef   : > { %1873 = dma.vmem_to_hbm [thread:$0]  (%p2202_p5), %s2566_s29, 32, %s2564_s28, %s1572_s17   ;;  %v1856_v16 = vpop.f32.mrb[19].mxu1 }
 0x6f0 PF: > { %s2647_s27 = sld [smem:[#allocation8_spill]]  ;;  %s2648_s21 = sld [smem:[#allocation6_spill]] }
 0x6f6   : > { %p1879_p2 = scmp.ge.s32.totalorder %s2647_s27, 2  ;;  %s1606_s20 = sand.u32 1, %s2648_s21  }
 0x6f7   : > { %s1607_s15 = scalar_lea.sflag [#allocation4], %s1606_s20 }
 0x6f8   : > { %p1876_p3 = pnand %p1879_p2, %p2206_p6 }
 0x6fa   : > { %2042 = dma.done.wait (!%p1876_p3), %s1607_s15, 32  }
 0x6fb   : > { %2044 = vsyncadd (!%p1876_p3), %s1607_s15, 4294967264  ;;  %s2650_s16 = sld [smem:[#allocation9_spill]]  ;;  %s2651_s24 = sld [smem:[#allocation7_spill]] }
 0x6fc   : > { %s2652_s15 = sld [smem:[#allocation10_spill]]  ;;  %s2653_s29 = smov %s2051_s30 }
 0x701   : > { %p25_p4 = scmp.ge.s32.totalorder %s2650_s16, 6   ;;  %s2654_s30 = smov %s2651_s24 }
 0x703   :  { %27 = sbr.rel (!%p25_p4) target bundleno = 5 (0x5), region = 123 }
 0x70a   :  { %1612 = vsyncpa [#allocation4], 1 }
 0x70b   :  { %1614 = vsyncpa [#allocation4 + $0x1], 1 }

</bundles_post_ra>
